<compile_context>
chip_gen: v7x
topology: tpu7x:2x2x1
jax: 0.10.0
libtpu: 0.0.40
codegen_flags: <defaults>
</compile_context>

<pallas_src>
import functools
import numpy as np

import jax
import jax.numpy as jnp
from jax.experimental import pallas as pl
from jax.experimental.pallas import tpu as pltpu


def _pick_tile(dim, max_tile=None,
               candidates=(8192, 4096, 2048, 1024, 512, 256, 128)):
    """Largest candidate (multiple of 128) dividing `dim` and <= max_tile.
    Falls back to the full dim (full-block exemption from (8,128))."""
    limit = dim if max_tile is None else min(dim, max_tile)
    for c in candidates:
        if c <= limit and dim % c == 0:
            return c
    return dim


# ----------------------------------------------------------------------------
# Pallas kernel: fused 8-layer autoencoder + cluster soft-assignment q
# ----------------------------------------------------------------------------
def _fused_kernel(x_ref, cm_ref, cl_ref,
                  we1, be1, we2, be2, we3, be3, wz, bz,
                  wd1, bd1, wd2, bd2, wd3, bd3, wxb, bxb,
                  xbar_ref, q_ref, *, with_pos, v, n_z):
    # Weight-stationary, lane-dense: h is (features, tile_n), weights are
    # pre-transposed (out, in) bf16, y = Wt @ h keeps tile_n on the MXU lanes.
    def lin(h_bf16, wt_ref, b_ref, relu):
        y = jnp.dot(wt_ref[...], h_bf16,
                    preferred_element_type=jnp.float32) + b_ref[...]
        return jnp.maximum(y, 0.0) if relu else y

    def bf(h):  # single bf16 pack per layer feeding the next dot
        return h.astype(jnp.bfloat16)

    x = x_ref[0]                                        # (n_in, tile_n) bf16
    h = lin(x, we1, be1, True)
    h = lin(bf(h), we2, be2, True)
    h = lin(bf(h), we3, be3, True)
    z = lin(bf(h), wz, bz, False)                       # (n_z, tile_n) f32
    h = lin(bf(z), wd1, bd1, True)
    h = lin(bf(h), wd2, bd2, True)
    h = lin(bf(h), wd3, bd3, True)
    xbar_ref[0] = lin(bf(h), wxb, bxb, False)           # (n_in, tile_n) f32

    # ---- fused cluster soft-assignment epilogue (points on lanes) ----
    zp = z * cm_ref[0] if with_pos else z               # (n_z, tile_n)

    # (x - mean) / std over the n_z (sublane) axis, std with ddof=1 (torch
    # default, no eps -- faithful); divide replaced by rsqrt (EUP slot).
    mean = jnp.mean(zp, axis=0, keepdims=True)
    cen = zp - mean
    var = jnp.sum(cen * cen, axis=0, keepdims=True) * (1.0 / (n_z - 1))
    zp = cen * jax.lax.rsqrt(var)

    # squared euclidean distance via MXU: |z|^2 + |c|^2 - 2 c.z -> (K, tile_n)
    cl = cl_ref[0]                                       # (K, n_z)
    zn = jnp.sum(zp * zp, axis=0, keepdims=True)         # (1, tile_n)
    cn = jnp.sum(cl * cl, axis=1, keepdims=True)         # (K, 1)
    dist = zn + cn - 2.0 * jnp.dot(cl, zp, preferred_element_type=jnp.float32)
    dist = jnp.maximum(dist, 0.0)

    # Faithful to the torch reference:
    #   q = (1/(1e-5 + d/v)) ** (-(v+1)/2)  ==  (1e-5 + d/v) ** ((v+1)/2)
    base = dist * (1.0 / v) + 1e-5
    expo = (v + 1.0) / 2.0
    q = base if expo == 1.0 else jnp.exp(expo * jnp.log(base))

    # Exact (non-approx) normalization over K: q feeds log() in the KL path.
    q_ref[0] = q / jnp.sum(q, axis=0, keepdims=True)


PARAM_NAMES = ["e1", "e2", "e3", "z", "d1", "d2", "d3", "xb"]


def fused_forward(x_t_bf16, cos_mult, cluster_layer, params, *, with_pos, v):
    """x_t_bf16: (B, n_in, N) bf16 lane-dense, cos_mult: (B, 1, N) f32,
    cluster_layer: (B, K, n_z) f32 -> (x_bar_t (B, n_in, N) f32,
                                       q (B, K, N) f32)."""
    B, n_in, N = x_t_bf16.shape
    K = cluster_layer.shape[1]
    n_z = params["wz"].shape[1]

    # Pre-transpose weights to (out, in) bf16 (resident, weight-stationary);
    # biases to lane-broadcast (out, 1) f32.  One-time tiny XLA ops under jit.
    flat = []
    for name in PARAM_NAMES:
        flat.append(jnp.transpose(params["w" + name]).astype(jnp.bfloat16))
        flat.append(jnp.transpose(params["b" + name]))          # (1,out)->(out,1)

    # >=2 grid steps on the point axis when possible so v7x's 2 TCs both engage.
    tile_n = _pick_tile(N, max_tile=max(128, N // 2))
    grid = (B, N // tile_n)

    # Weights/biases: constant block index -> resident across the grid.
    param_specs = [pl.BlockSpec(p.shape, lambda b, n: (0, 0)) for p in flat]

    kern = functools.partial(_fused_kernel, with_pos=with_pos, v=float(v),
                             n_z=n_z)
    return pl.pallas_call(
        kern,
        out_shape=(jax.ShapeDtypeStruct((B, n_in, N), jnp.float32),
                   jax.ShapeDtypeStruct((B, K, N), jnp.float32)),
        grid=grid,
        in_specs=[pl.BlockSpec((1, n_in, tile_n), lambda b, n: (b, 0, n)),
                  pl.BlockSpec((1, 1, tile_n), lambda b, n: (b, 0, n)),
                  pl.BlockSpec((1, K, n_z), lambda b, n: (b, 0, 0))]
                 + param_specs,
        out_specs=(pl.BlockSpec((1, n_in, tile_n), lambda b, n: (b, 0, n)),
                   pl.BlockSpec((1, K, tile_n), lambda b, n: (b, 0, n))),
        compiler_params=pltpu.CompilerParams(
            dimension_semantics=("parallel", "parallel")),
    )(x_t_bf16, cos_mult, cluster_layer, *flat)


# ----------------------------------------------------------------------------
# Plain-JAX glue (target distribution, losses) on the lane-dense (B, K, N) q
# ----------------------------------------------------------------------------
def stat_target_distribution_kn(q_kn, predict, c):
    """q_kn: (B, K, N). Implements the batch_size == 1 branch of the torch ref
    (the test uses B=1); the per-cluster loop is vectorized."""
    B, C, N_pts = q_kn.shape
    q2 = q_kn ** 2

    u = jnp.sum(q_kn, axis=2, keepdims=True)                          # (B,C,1)
    u = (u - jnp.mean(u, axis=1, keepdims=True)) / \
        jnp.std(u, axis=1, keepdims=True, ddof=1)

    counts = jnp.bincount(predict.reshape(-1), length=C)
    Ncnt = jnp.where(counts > 0, counts, 1).astype(q_kn.dtype)        # (C,)

    # temp_q <= 0 ; sqrt(-N_i/temp_q_j) = sqrt(N_i) * sqrt(-1/temp_q_j)
    temp_q = (1.0 - q_kn) ** 2 * jnp.log(q_kn) * N_pts                 # (B,C,N)
    s = jnp.sum(jnp.sqrt(-1.0 / temp_q.reshape(B, -1)), axis=1)        # (B,)
    v = jnp.sqrt(Ncnt)[None, :, None] * s[:, None, None]               # (B,C,1)
    v = (v - jnp.mean(v, axis=1, keepdims=True)) / \
        jnp.std(v, axis=1, keepdims=True, ddof=1)

    u = u - jnp.min(u) + 0.001
    v = v - jnp.min(v) + 0.001

    f = u + v + c                                                      # (B,C,1)
    w1 = q2 / f                                                        # (B,C,N)
    w2 = jnp.sum(w1, axis=1, keepdims=True)                            # (B,1,N)
    return w1 / w2, v, u


def cal_grad_loss(cluster_layer):
    d = jnp.sum((cluster_layer[:, :, None, :] -
                 cluster_layer[:, None, :, :]) ** 2, axis=-1)
    B, K, _ = d.shape
    mean_distance = jnp.sum(d) / (d.size - B * K)
    return 1.0 / mean_distance


def bdec_forward(params, cluster_layer, x, t1_coordinate, previous_predict,
                 *, with_pos, v, c):
    B, N, n_in = x.shape

    # One cheap XLA relayout to lane-dense (B, n_in, N); every Pallas matmul /
    # store then runs with the big point axis on the 128-wide lane dimension.
    x_t = jnp.transpose(x, (0, 2, 1))                                  # f32
    cos_mult = (jnp.prod(t1_coordinate * 0.01, axis=-1) * 0.99 + 1.0)[:, None, :]

    # TODO(synk): kmeans init of cluster_layer (training-only, is_first branch)
    # has no clean Pallas equivalent here; cluster_layer is initialized in-script.
    x_bar_t, q_kn = fused_forward(x_t.astype(jnp.bfloat16), cos_mult,
                                  cluster_layer, params,
                                  with_pos=with_pos, v=v)

    predict = jnp.argmax(q_kn, axis=1)                                 # (B, N)
    change_rate = jnp.sum(predict != previous_predict) / previous_predict.size

    p, _v_stat, _u_stat = stat_target_distribution_kn(q_kn, predict, c)

    kl_loss = jnp.mean(p * (jnp.log(p) - jnp.log(q_kn))) * 0.01
    re_loss = jnp.mean((x_bar_t - x_t) ** 2)
    u_loss = cal_grad_loss(cluster_layer) * 0.01
    loss = kl_loss + re_loss + u_loss
    return predict, loss, (kl_loss, re_loss, u_loss, change_rate)


# ----------------------------------------------------------------------------
# Deterministic parameter construction
# ----------------------------------------------------------------------------
def xavier_normal(key, fan_in, fan_out, shape):
    std = float(np.sqrt(2.0 / (fan_in + fan_out)))
    return jax.random.normal(key, shape, jnp.float32) * std


def make_params(key, n_input, n_enc_1, n_enc_2, n_enc_3,
                n_dec_1, n_dec_2, n_dec_3, n_z):
    dims = [
        ("we1", n_input, n_enc_1), ("we2", n_enc_1, n_enc_2),
        ("we3", n_enc_2, n_enc_3), ("wz", n_enc_3, n_z),
        ("wd1", n_z, n_dec_1), ("wd2", n_dec_1, n_dec_2),
        ("wd3", n_dec_2, n_dec_3), ("wxb", n_dec_3, n_input),
    ]
    params = {}
    keys = jax.random.split(key, len(dims))
    for k, (name, fi, fo) in zip(keys, dims):
        params[name] = xavier_normal(k, fi, fo, (fi, fo))
        params["b" + name[1:]] = jnp.zeros((1, fo), jnp.float32)
    return params


if __name__ == "__main__":
    # Small, consistent shapes (point_num downscaled from 29696 to 256).
    B, N = 1, 256
    n_input, n_enc_1, n_enc_2, n_enc_3 = 32, 64, 64, 128
    n_dec_1, n_dec_2, n_dec_3 = 128, 64, 64
    n_z, n_clusters = 16, 8
    v_param, c_param, with_pos = 1.0, 1.0, True

    root = jax.random.PRNGKey(0)
    k_params, k_clu, k_x, k_t1 = jax.random.split(root, 4)

    params = make_params(k_params, n_input, n_enc_1, n_enc_2, n_enc_3,
                         n_dec_1, n_dec_2, n_dec_3, n_z)
    # cluster_layer ~ xavier_normal on a (B, K, Z) tensor
    fan_in, fan_out = n_clusters * n_z, B * n_z
    cluster_layer = jax.random.normal(k_clu, (B, n_clusters, n_z), jnp.float32) * \
        float(np.sqrt(2.0 / (fan_in + fan_out)))

    x = jax.random.normal(k_x, (B, N, n_input), jnp.float32)
    t1_coordinate = jax.random.uniform(k_t1, (B, N, 3), jnp.float32,
                                       minval=-100.0, maxval=100.0)
    previous_predict = jnp.zeros((B, N), jnp.int32)   # previous_predict_q init

    fwd = jax.jit(functools.partial(bdec_forward, with_pos=with_pos,
                                    v=v_param, c=c_param))
    predict, loss, (kl_loss, re_loss, u_loss, change_rate) = fwd(
        params, cluster_layer, x, t1_coordinate, previous_predict)
    jax.block_until_ready((predict, loss))

    pred_np = np.asarray(predict)
    clu_num = sum(len(np.unique(pred_np[i])) for i in range(pred_np.shape[0]))
    print(f"classify num：{int(clu_num / pred_np.shape[0])}\n")
    print(f"kl_loss:{float(kl_loss)}\tre_loss:{float(re_loss)}\t"
          f"u_loss:{float(u_loss)}\tLoss:{float(loss)}\t"
          f"change_rate_mean:{float(change_rate)}\tmin:1")

    assert np.isfinite(float(loss))
    print("KERNEL_OK")
</pallas_src>

<mosaic_0001>
module attributes {stable_mosaic.version = 11 : i64} {
  func.func private @main(%arg0: i32) attributes {dimension_semantics = [#tpu.dimension_semantics<core_parallel>], iteration_bounds = array<i64: 2>, tpu.core_type = #tpu.core_type<sc_scalar_subcore>, window_params = []} {
    return
  }
}

module attributes {stable_mosaic.version = 11 : i64} {
  func.func private @main(%arg0: i32) attributes {dimension_semantics = [#tpu.dimension_semantics<core_parallel>], iteration_bounds = array<i64: 2>, tpu.core_type = #tpu.core_type<sc_scalar_subcore>, window_params = []} {
    return
  }
}

module attributes {stable_mosaic.version = 11 : i64} {
  func.func @_fused_kernel(%arg0: i32, %arg1: i32, %arg2: memref<1x32x128xbf16, #tpu.memory_space<vmem>>, %arg3: memref<1x1x128xf32, #tpu.memory_space<vmem>>, %arg4: memref<1x8x16xf32, #tpu.memory_space<vmem>>, %arg5: memref<64x32xbf16, #tpu.memory_space<vmem>>, %arg6: memref<64x1xf32, #tpu.memory_space<vmem>>, %arg7: memref<64x64xbf16, #tpu.memory_space<vmem>>, %arg8: memref<64x1xf32, #tpu.memory_space<vmem>>, %arg9: memref<128x64xbf16, #tpu.memory_space<vmem>>, %arg10: memref<128x1xf32, #tpu.memory_space<vmem>>, %arg11: memref<16x128xbf16, #tpu.memory_space<vmem>>, %arg12: memref<16x1xf32, #tpu.memory_space<vmem>>, %arg13: memref<128x16xbf16, #tpu.memory_space<vmem>>, %arg14: memref<128x1xf32, #tpu.memory_space<vmem>>, %arg15: memref<64x128xbf16, #tpu.memory_space<vmem>>, %arg16: memref<64x1xf32, #tpu.memory_space<vmem>>, %arg17: memref<64x64xbf16, #tpu.memory_space<vmem>>, %arg18: memref<64x1xf32, #tpu.memory_space<vmem>>, %arg19: memref<32x64xbf16, #tpu.memory_space<vmem>>, %arg20: memref<32x1xf32, #tpu.memory_space<vmem>>, %arg21: memref<1x32x128xf32, #tpu.memory_space<vmem>>, %arg22: memref<1x8x128xf32, #tpu.memory_space<vmem>>) attributes {dimension_semantics = [#tpu.dimension_semantics<parallel>, #tpu.dimension_semantics<parallel>], iteration_bounds = array<i64: 1, 2>, scalar_prefetch = 0 : i64, scratch_operands = 0 : i64, tpu.core_type = #tpu.core_type<tc>, window_params = [{transform_indices = @transform_0, window_bounds = array<i64: 1, 32, 128>}, {transform_indices = @transform_1, window_bounds = array<i64: 1, 1, 128>}, {transform_indices = @transform_2, window_bounds = array<i64: 1, 8, 16>}, {pipeline_mode = #tpu.pipeline_mode<synchronous>, transform_indices = @transform_3, window_bounds = array<i64: 64, 32>}, {pipeline_mode = #tpu.pipeline_mode<synchronous>, transform_indices = @transform_4, window_bounds = array<i64: 64, 1>}, {pipeline_mode = #tpu.pipeline_mode<synchronous>, transform_indices = @transform_5, window_bounds = array<i64: 64, 64>}, {pipeline_mode = #tpu.pipeline_mode<synchronous>, transform_indices = @transform_6, window_bounds = array<i64: 64, 1>}, {pipeline_mode = #tpu.pipeline_mode<synchronous>, transform_indices = @transform_7, window_bounds = array<i64: 128, 64>}, {pipeline_mode = #tpu.pipeline_mode<synchronous>, transform_indices = @transform_8, window_bounds = array<i64: 128, 1>}, {pipeline_mode = #tpu.pipeline_mode<synchronous>, transform_indices = @transform_9, window_bounds = array<i64: 16, 128>}, {pipeline_mode = #tpu.pipeline_mode<synchronous>, transform_indices = @transform_10, window_bounds = array<i64: 16, 1>}, {pipeline_mode = #tpu.pipeline_mode<synchronous>, transform_indices = @transform_11, window_bounds = array<i64: 128, 16>}, {pipeline_mode = #tpu.pipeline_mode<synchronous>, transform_indices = @transform_12, window_bounds = array<i64: 128, 1>}, {pipeline_mode = #tpu.pipeline_mode<synchronous>, transform_indices = @transform_13, window_bounds = array<i64: 64, 128>}, {pipeline_mode = #tpu.pipeline_mode<synchronous>, transform_indices = @transform_14, window_bounds = array<i64: 64, 1>}, {pipeline_mode = #tpu.pipeline_mode<synchronous>, transform_indices = @transform_15, window_bounds = array<i64: 64, 64>}, {pipeline_mode = #tpu.pipeline_mode<synchronous>, transform_indices = @transform_16, window_bounds = array<i64: 64, 1>}, {pipeline_mode = #tpu.pipeline_mode<synchronous>, transform_indices = @transform_17, window_bounds = array<i64: 32, 64>}, {pipeline_mode = #tpu.pipeline_mode<synchronous>, transform_indices = @transform_18, window_bounds = array<i64: 32, 1>}, {transform_indices = @transform_19, window_bounds = array<i64: 1, 32, 128>}, {transform_indices = @transform_20, window_bounds = array<i64: 1, 8, 128>}]} {
    %c0 = arith.constant 0 : index
    %c0_0 = arith.constant 0 : index
    %c0_1 = arith.constant 0 : index
    %0 = vector.load %arg2[%c0, %c0_0, %c0_1] : memref<1x32x128xbf16, #tpu.memory_space<vmem>>, vector<1x32x128xbf16>
    %1 = vector.shape_cast %0 : vector<1x32x128xbf16> to vector<32x128xbf16>
    %c0_2 = arith.constant 0 : index
    %c0_3 = arith.constant 0 : index
    %2 = vector.load %arg5[%c0_2, %c0_3] : memref<64x32xbf16, #tpu.memory_space<vmem>>, vector<64x32xbf16>
    %cst = arith.constant dense<0.000000e+00> : vector<64x128xf32>
    %3 = tpu.matmul %2, %1, %cst {dimension_numbers = #tpu.dot_dimension_numbers<[1], [0], [0], [1], [0, 0, 1, 1], [], []>} : vector<64x32xbf16>, vector<32x128xbf16>, vector<64x128xf32> -> vector<64x128xf32>
    %c0_4 = arith.constant 0 : index
    %c0_5 = arith.constant 0 : index
    %4 = vector.load %arg6[%c0_4, %c0_5] : memref<64x1xf32, #tpu.memory_space<vmem>>, vector<64x1xf32>
    %5 = vector.broadcast %4 : vector<64x1xf32> to vector<64x128xf32>
    %6 = arith.addf %3, %5 : vector<64x128xf32>
    %cst_6 = arith.constant 0.000000e+00 : f32
    %7 = vector.broadcast %cst_6 : f32 to vector<64x128xf32>
    %8 = arith.maximumf %6, %7 : vector<64x128xf32>
    %9 = arith.truncf %8 : vector<64x128xf32> to vector<64x128xbf16>
    %c0_7 = arith.constant 0 : index
    %c0_8 = arith.constant 0 : index
    %10 = vector.load %arg7[%c0_7, %c0_8] : memref<64x64xbf16, #tpu.memory_space<vmem>>, vector<64x64xbf16>
    %cst_9 = arith.constant dense<0.000000e+00> : vector<64x128xf32>
    %11 = tpu.matmul %10, %9, %cst_9 {dimension_numbers = #tpu.dot_dimension_numbers<[1], [0], [0], [1], [0, 0, 1, 1], [], []>} : vector<64x64xbf16>, vector<64x128xbf16>, vector<64x128xf32> -> vector<64x128xf32>
    %c0_10 = arith.constant 0 : index
    %c0_11 = arith.constant 0 : index
    %12 = vector.load %arg8[%c0_10, %c0_11] : memref<64x1xf32, #tpu.memory_space<vmem>>, vector<64x1xf32>
    %13 = vector.broadcast %12 : vector<64x1xf32> to vector<64x128xf32>
    %14 = arith.addf %11, %13 : vector<64x128xf32>
    %cst_12 = arith.constant 0.000000e+00 : f32
    %15 = vector.broadcast %cst_12 : f32 to vector<64x128xf32>
    %16 = arith.maximumf %14, %15 : vector<64x128xf32>
    %17 = arith.truncf %16 : vector<64x128xf32> to vector<64x128xbf16>
    %c0_13 = arith.constant 0 : index
    %c0_14 = arith.constant 0 : index
    %18 = vector.load %arg9[%c0_13, %c0_14] : memref<128x64xbf16, #tpu.memory_space<vmem>>, vector<128x64xbf16>
    %cst_15 = arith.constant dense<0.000000e+00> : vector<128x128xf32>
    %19 = tpu.matmul %18, %17, %cst_15 {dimension_numbers = #tpu.dot_dimension_numbers<[1], [0], [0], [1], [0, 0, 1, 1], [], []>} : vector<128x64xbf16>, vector<64x128xbf16>, vector<128x128xf32> -> vector<128x128xf32>
    %c0_16 = arith.constant 0 : index
    %c0_17 = arith.constant 0 : index
    %20 = vector.load %arg10[%c0_16, %c0_17] : memref<128x1xf32, #tpu.memory_space<vmem>>, vector<128x1xf32>
    %21 = vector.broadcast %20 : vector<128x1xf32> to vector<128x128xf32>
    %22 = arith.addf %19, %21 : vector<128x128xf32>
    %cst_18 = arith.constant 0.000000e+00 : f32
    %23 = vector.broadcast %cst_18 : f32 to vector<128x128xf32>
    %24 = arith.maximumf %22, %23 : vector<128x128xf32>
    %25 = arith.truncf %24 : vector<128x128xf32> to vector<128x128xbf16>
    %c0_19 = arith.constant 0 : index
    %c0_20 = arith.constant 0 : index
    %26 = vector.load %arg11[%c0_19, %c0_20] : memref<16x128xbf16, #tpu.memory_space<vmem>>, vector<16x128xbf16>
    %cst_21 = arith.constant dense<0.000000e+00> : vector<16x128xf32>
    %27 = tpu.matmul %26, %25, %cst_21 {dimension_numbers = #tpu.dot_dimension_numbers<[1], [0], [0], [1], [0, 0, 1, 1], [], []>} : vector<16x128xbf16>, vector<128x128xbf16>, vector<16x128xf32> -> vector<16x128xf32>
    %c0_22 = arith.constant 0 : index
    %c0_23 = arith.constant 0 : index
    %28 = vector.load %arg12[%c0_22, %c0_23] : memref<16x1xf32, #tpu.memory_space<vmem>>, vector<16x1xf32>
    %29 = vector.broadcast %28 : vector<16x1xf32> to vector<16x128xf32>
    %30 = arith.addf %27, %29 : vector<16x128xf32>
    %31 = arith.truncf %30 : vector<16x128xf32> to vector<16x128xbf16>
    %c0_24 = arith.constant 0 : index
    %c0_25 = arith.constant 0 : index
    %32 = vector.load %arg13[%c0_24, %c0_25] : memref<128x16xbf16, #tpu.memory_space<vmem>>, vector<128x16xbf16>
    %cst_26 = arith.constant dense<0.000000e+00> : vector<128x128xf32>
    %33 = tpu.matmul %32, %31, %cst_26 {dimension_numbers = #tpu.dot_dimension_numbers<[1], [0], [0], [1], [0, 0, 1, 1], [], []>} : vector<128x16xbf16>, vector<16x128xbf16>, vector<128x128xf32> -> vector<128x128xf32>
    %c0_27 = arith.constant 0 : index
    %c0_28 = arith.constant 0 : index
    %34 = vector.load %arg14[%c0_27, %c0_28] : memref<128x1xf32, #tpu.memory_space<vmem>>, vector<128x1xf32>
    %35 = vector.broadcast %34 : vector<128x1xf32> to vector<128x128xf32>
    %36 = arith.addf %33, %35 : vector<128x128xf32>
    %cst_29 = arith.constant 0.000000e+00 : f32
    %37 = vector.broadcast %cst_29 : f32 to vector<128x128xf32>
    %38 = arith.maximumf %36, %37 : vector<128x128xf32>
    %39 = arith.truncf %38 : vector<128x128xf32> to vector<128x128xbf16>
    %c0_30 = arith.constant 0 : index
    %c0_31 = arith.constant 0 : index
    %40 = vector.load %arg15[%c0_30, %c0_31] : memref<64x128xbf16, #tpu.memory_space<vmem>>, vector<64x128xbf16>
    %cst_32 = arith.constant dense<0.000000e+00> : vector<64x128xf32>
    %41 = tpu.matmul %40, %39, %cst_32 {dimension_numbers = #tpu.dot_dimension_numbers<[1], [0], [0], [1], [0, 0, 1, 1], [], []>} : vector<64x128xbf16>, vector<128x128xbf16>, vector<64x128xf32> -> vector<64x128xf32>
    %c0_33 = arith.constant 0 : index
    %c0_34 = arith.constant 0 : index
    %42 = vector.load %arg16[%c0_33, %c0_34] : memref<64x1xf32, #tpu.memory_space<vmem>>, vector<64x1xf32>
    %43 = vector.broadcast %42 : vector<64x1xf32> to vector<64x128xf32>
    %44 = arith.addf %41, %43 : vector<64x128xf32>
    %cst_35 = arith.constant 0.000000e+00 : f32
    %45 = vector.broadcast %cst_35 : f32 to vector<64x128xf32>
    %46 = arith.maximumf %44, %45 : vector<64x128xf32>
    %47 = arith.truncf %46 : vector<64x128xf32> to vector<64x128xbf16>
    %c0_36 = arith.constant 0 : index
    %c0_37 = arith.constant 0 : index
    %48 = vector.load %arg17[%c0_36, %c0_37] : memref<64x64xbf16, #tpu.memory_space<vmem>>, vector<64x64xbf16>
    %cst_38 = arith.constant dense<0.000000e+00> : vector<64x128xf32>
    %49 = tpu.matmul %48, %47, %cst_38 {dimension_numbers = #tpu.dot_dimension_numbers<[1], [0], [0], [1], [0, 0, 1, 1], [], []>} : vector<64x64xbf16>, vector<64x128xbf16>, vector<64x128xf32> -> vector<64x128xf32>
    %c0_39 = arith.constant 0 : index
    %c0_40 = arith.constant 0 : index
    %50 = vector.load %arg18[%c0_39, %c0_40] : memref<64x1xf32, #tpu.memory_space<vmem>>, vector<64x1xf32>
    %51 = vector.broadcast %50 : vector<64x1xf32> to vector<64x128xf32>
    %52 = arith.addf %49, %51 : vector<64x128xf32>
    %cst_41 = arith.constant 0.000000e+00 : f32
    %53 = vector.broadcast %cst_41 : f32 to vector<64x128xf32>
    %54 = arith.maximumf %52, %53 : vector<64x128xf32>
    %55 = arith.truncf %54 : vector<64x128xf32> to vector<64x128xbf16>
    %c0_42 = arith.constant 0 : index
    %c0_43 = arith.constant 0 : index
    %56 = vector.load %arg19[%c0_42, %c0_43] : memref<32x64xbf16, #tpu.memory_space<vmem>>, vector<32x64xbf16>
    %cst_44 = arith.constant dense<0.000000e+00> : vector<32x128xf32>
    %57 = tpu.matmul %56, %55, %cst_44 {dimension_numbers = #tpu.dot_dimension_numbers<[1], [0], [0], [1], [0, 0, 1, 1], [], []>} : vector<32x64xbf16>, vector<64x128xbf16>, vector<32x128xf32> -> vector<32x128xf32>
    %c0_45 = arith.constant 0 : index
    %c0_46 = arith.constant 0 : index
    %58 = vector.load %arg20[%c0_45, %c0_46] : memref<32x1xf32, #tpu.memory_space<vmem>>, vector<32x1xf32>
    %59 = vector.broadcast %58 : vector<32x1xf32> to vector<32x128xf32>
    %60 = arith.addf %57, %59 : vector<32x128xf32>
    %c0_47 = arith.constant 0 : index
    %c0_48 = arith.constant 0 : index
    %c0_49 = arith.constant 0 : index
    %61 = vector.load %arg21[%c0_47, %c0_48, %c0_49] : memref<1x32x128xf32, #tpu.memory_space<vmem>>, vector<1x32x128xf32>
    %62 = vector.shape_cast %61 : vector<1x32x128xf32> to vector<32x128xf32>
    %63 = vector.shape_cast %60 : vector<32x128xf32> to vector<1x32x128xf32>
    tpu.vector_store %arg21[%c0_47, %c0_48, %c0_49], %63 {strides = array<i32>} : memref<1x32x128xf32, #tpu.memory_space<vmem>>, vector<1x32x128xf32>,
    %c0_50 = arith.constant 0 : index
    %c0_51 = arith.constant 0 : index
    %c0_52 = arith.constant 0 : index
    %64 = vector.load %arg3[%c0_50, %c0_51, %c0_52] : memref<1x1x128xf32, #tpu.memory_space<vmem>>, vector<1x1x128xf32>
    %65 = vector.shape_cast %64 : vector<1x1x128xf32> to vector<1x128xf32>
    %66 = vector.broadcast %65 : vector<1x128xf32> to vector<16x128xf32>
    %67 = arith.mulf %30, %66 : vector<16x128xf32>
    %cst_53 = arith.constant dense<0.000000e+00> : vector<128xf32>
    %68 = vector.multi_reduction <add>, %67, %cst_53 [0] : vector<16x128xf32> to vector<128xf32>
    %69 = vector.shape_cast %68 : vector<128xf32> to vector<1x128xf32>
    %cst_54 = arith.constant 1.600000e+01 : f32
    %70 = vector.broadcast %cst_54 : f32 to vector<1x128xf32>
    %71 = arith.divf %69, %70 : vector<1x128xf32>
    %72 = vector.broadcast %71 : vector<1x128xf32> to vector<16x128xf32>
    %73 = arith.subf %67, %72 : vector<16x128xf32>
    %74 = arith.mulf %73, %73 : vector<16x128xf32>
    %cst_55 = arith.constant dense<0.000000e+00> : vector<128xf32>
    %75 = vector.multi_reduction <add>, %74, %cst_55 [0] : vector<16x128xf32> to vector<128xf32>
    %76 = vector.shape_cast %75 : vector<128xf32> to vector<1x128xf32>
    %cst_56 = arith.constant 0.0666666701 : f32
    %77 = vector.broadcast %cst_56 : f32 to vector<1x128xf32>
    %78 = arith.mulf %76, %77 : vector<1x128xf32>
    %79 = math.rsqrt %78 : vector<1x128xf32>
    %80 = vector.broadcast %79 : vector<1x128xf32> to vector<16x128xf32>
    %81 = arith.mulf %73, %80 : vector<16x128xf32>
    %c0_57 = arith.constant 0 : index
    %c0_58 = arith.constant 0 : index
    %c0_59 = arith.constant 0 : index
    %82 = vector.load %arg4[%c0_57, %c0_58, %c0_59] : memref<1x8x16xf32, #tpu.memory_space<vmem>>, vector<1x8x16xf32>
    %83 = vector.shape_cast %82 : vector<1x8x16xf32> to vector<8x16xf32>
    %84 = arith.mulf %81, %81 : vector<16x128xf32>
    %cst_60 = arith.constant dense<0.000000e+00> : vector<128xf32>
    %85 = vector.multi_reduction <add>, %84, %cst_60 [0] : vector<16x128xf32> to vector<128xf32>
    %86 = vector.shape_cast %85 : vector<128xf32> to vector<1x128xf32>
    %87 = arith.mulf %83, %83 : vector<8x16xf32>
    %cst_61 = arith.constant dense<0.000000e+00> : vector<8xf32>
    %88 = vector.multi_reduction <add>, %87, %cst_61 [1] : vector<8x16xf32> to vector<8xf32>
    %89 = vector.shape_cast %88 : vector<8xf32> to vector<8x1xf32>
    %90 = vector.broadcast %86 : vector<1x128xf32> to vector<8x128xf32>
    %91 = vector.broadcast %89 : vector<8x1xf32> to vector<8x128xf32>
    %92 = arith.addf %90, %91 : vector<8x128xf32>
    %cst_62 = arith.constant dense<0.000000e+00> : vector<8x128xf32>
    %93 = tpu.matmul %83, %81, %cst_62 {dimension_numbers = #tpu.dot_dimension_numbers<[1], [0], [0], [1], [0, 0, 1, 1], [], []>} : vector<8x16xf32>, vector<16x128xf32>, vector<8x128xf32> -> vector<8x128xf32>
    %cst_63 = arith.constant 2.000000e+00 : f32
    %94 = vector.broadcast %cst_63 : f32 to vector<8x128xf32>
    %95 = arith.mulf %94, %93 : vector<8x128xf32>
    %96 = arith.subf %92, %95 : vector<8x128xf32>
    %cst_64 = arith.constant 0.000000e+00 : f32
    %97 = vector.broadcast %cst_64 : f32 to vector<8x128xf32>
    %98 = arith.maximumf %96, %97 : vector<8x128xf32>
    %cst_65 = arith.constant 1.000000e+00 : f32
    %99 = vector.broadcast %cst_65 : f32 to vector<8x128xf32>
    %100 = arith.mulf %98, %99 : vector<8x128xf32>
    %cst_66 = arith.constant 9.99999974E-6 : f32
    %101 = vector.broadcast %cst_66 : f32 to vector<8x128xf32>
    %102 = arith.addf %100, %101 : vector<8x128xf32>
    %cst_67 = arith.constant dense<0.000000e+00> : vector<128xf32>
    %103 = vector.multi_reduction <add>, %102, %cst_67 [0] : vector<8x128xf32> to vector<128xf32>
    %104 = vector.shape_cast %103 : vector<128xf32> to vector<1x128xf32>
    %105 = vector.broadcast %104 : vector<1x128xf32> to vector<8x128xf32>
    %106 = arith.divf %102, %105 : vector<8x128xf32>
    %c0_68 = arith.constant 0 : index
    %c0_69 = arith.constant 0 : index
    %c0_70 = arith.constant 0 : index
    %107 = vector.load %arg22[%c0_68, %c0_69, %c0_70] : memref<1x8x128xf32, #tpu.memory_space<vmem>>, vector<1x8x128xf32>
    %108 = vector.shape_cast %107 : vector<1x8x128xf32> to vector<8x128xf32>
    %109 = vector.shape_cast %106 : vector<8x128xf32> to vector<1x8x128xf32>
    tpu.vector_store %arg22[%c0_68, %c0_69, %c0_70], %109 {strides = array<i32>} : memref<1x8x128xf32, #tpu.memory_space<vmem>>, vector<1x8x128xf32>,
    return
  }
  func.func @transform_0(%arg0: i32, %arg1: i32) -> (i32, i32, i32) {
    %c0_i32 = arith.constant 0 : i32
    %c0_i32_0 = arith.constant 0 : i32
    return %arg0, %c0_i32, %arg1 : i32, i32, i32
  }
  func.func @transform_1(%arg0: i32, %arg1: i32) -> (i32, i32, i32) {
    %c0_i32 = arith.constant 0 : i32
    %c0_i32_0 = arith.constant 0 : i32
    return %arg0, %c0_i32, %arg1 : i32, i32, i32
  }
  func.func @transform_2(%arg0: i32, %arg1: i32) -> (i32, i32, i32) {
    %c0_i32 = arith.constant 0 : i32
    %c0_i32_0 = arith.constant 0 : i32
    %c0_i32_1 = arith.constant 0 : i32
    return %arg0, %c0_i32, %c0_i32_0 : i32, i32, i32
  }
  func.func @transform_3(%arg0: i32, %arg1: i32) -> (i32, i32) {
    %c0_i32 = arith.constant 0 : i32
    %c0_i32_0 = arith.constant 0 : i32
    %c0_i32_1 = arith.constant 0 : i32
    return %c0_i32, %c0_i32_0 : i32, i32
  }
  func.func @transform_4(%arg0: i32, %arg1: i32) -> (i32, i32) {
    %c0_i32 = arith.constant 0 : i32
    %c0_i32_0 = arith.constant 0 : i32
    %c0_i32_1 = arith.constant 0 : i32
    return %c0_i32, %c0_i32_0 : i32, i32
  }
  func.func @transform_5(%arg0: i32, %arg1: i32) -> (i32, i32) {
    %c0_i32 = arith.constant 0 : i32
    %c0_i32_0 = arith.constant 0 : i32
    %c0_i32_1 = arith.constant 0 : i32
    return %c0_i32, %c0_i32_0 : i32, i32
  }
  func.func @transform_6(%arg0: i32, %arg1: i32) -> (i32, i32) {
    %c0_i32 = arith.constant 0 : i32
    %c0_i32_0 = arith.constant 0 : i32
    %c0_i32_1 = arith.constant 0 : i32
    return %c0_i32, %c0_i32_0 : i32, i32
  }
  func.func @transform_7(%arg0: i32, %arg1: i32) -> (i32, i32) {
    %c0_i32 = arith.constant 0 : i32
    %c0_i32_0 = arith.constant 0 : i32
    %c0_i32_1 = arith.constant 0 : i32
    return %c0_i32, %c0_i32_0 : i32, i32
  }
  func.func @transform_8(%arg0: i32, %arg1: i32) -> (i32, i32) {
    %c0_i32 = arith.constant 0 : i32
    %c0_i32_0 = arith.constant 0 : i32
    %c0_i32_1 = arith.constant 0 : i32
    return %c0_i32, %c0_i32_0 : i32, i32
  }
  func.func @transform_9(%arg0: i32, %arg1: i32) -> (i32, i32) {
    %c0_i32 = arith.constant 0 : i32
    %c0_i32_0 = arith.constant 0 : i32
    %c0_i32_1 = arith.constant 0 : i32
    return %c0_i32, %c0_i32_0 : i32, i32
  }
  func.func @transform_10(%arg0: i32, %arg1: i32) -> (i32, i32) {
    %c0_i32 = arith.constant 0 : i32
    %c0_i32_0 = arith.constant 0 : i32
    %c0_i32_1 = arith.constant 0 : i32
    return %c0_i32, %c0_i32_0 : i32, i32
  }
  func.func @transform_11(%arg0: i32, %arg1: i32) -> (i32, i32) {
    %c0_i32 = arith.constant 0 : i32
    %c0_i32_0 = arith.constant 0 : i32
    %c0_i32_1 = arith.constant 0 : i32
    return %c0_i32, %c0_i32_0 : i32, i32
  }
  func.func @transform_12(%arg0: i32, %arg1: i32) -> (i32, i32) {
    %c0_i32 = arith.constant 0 : i32
    %c0_i32_0 = arith.constant 0 : i32
    %c0_i32_1 = arith.constant 0 : i32
    return %c0_i32, %c0_i32_0 : i32, i32
  }
  func.func @transform_13(%arg0: i32, %arg1: i32) -> (i32, i32) {
    %c0_i32 = arith.constant 0 : i32
    %c0_i32_0 = arith.constant 0 : i32
    %c0_i32_1 = arith.constant 0 : i32
    return %c0_i32, %c0_i32_0 : i32, i32
  }
  func.func @transform_14(%arg0: i32, %arg1: i32) -> (i32, i32) {
    %c0_i32 = arith.constant 0 : i32
    %c0_i32_0 = arith.constant 0 : i32
    %c0_i32_1 = arith.constant 0 : i32
    return %c0_i32, %c0_i32_0 : i32, i32
  }
  func.func @transform_15(%arg0: i32, %arg1: i32) -> (i32, i32) {
    %c0_i32 = arith.constant 0 : i32
    %c0_i32_0 = arith.constant 0 : i32
    %c0_i32_1 = arith.constant 0 : i32
    return %c0_i32, %c0_i32_0 : i32, i32
  }
  func.func @transform_16(%arg0: i32, %arg1: i32) -> (i32, i32) {
    %c0_i32 = arith.constant 0 : i32
    %c0_i32_0 = arith.constant 0 : i32
    %c0_i32_1 = arith.constant 0 : i32
    return %c0_i32, %c0_i32_0 : i32, i32
  }
  func.func @transform_17(%arg0: i32, %arg1: i32) -> (i32, i32) {
    %c0_i32 = arith.constant 0 : i32
    %c0_i32_0 = arith.constant 0 : i32
    %c0_i32_1 = arith.constant 0 : i32
    return %c0_i32, %c0_i32_0 : i32, i32
  }
  func.func @transform_18(%arg0: i32, %arg1: i32) -> (i32, i32) {
    %c0_i32 = arith.constant 0 : i32
    %c0_i32_0 = arith.constant 0 : i32
    %c0_i32_1 = arith.constant 0 : i32
    return %c0_i32, %c0_i32_0 : i32, i32
  }
  func.func @transform_19(%arg0: i32, %arg1: i32) -> (i32, i32, i32) {
    %c0_i32 = arith.constant 0 : i32
    %c0_i32_0 = arith.constant 0 : i32
    return %arg0, %c0_i32, %arg1 : i32, i32, i32
  }
  func.func @transform_20(%arg0: i32, %arg1: i32) -> (i32, i32, i32) {
    %c0_i32 = arith.constant 0 : i32
    %c0_i32_0 = arith.constant 0 : i32
    return %arg0, %c0_i32, %arg1 : i32, i32, i32
  }
}

</mosaic_0001>

<bundles_post_ra>
// kernel: bdec_forward.1
= control target key start
LH: loop header
LB: loop body
LE: loop exit
PB: predicated region body
PF: predicated region fallthrough
CT: control target
= control target key end

     0   :  { %s3538_s0 = inlined_call_operand.vmem [shape: bf16[1,32,256], index: 0, kind: input, shape index: {}]   ;;  %s3539_s1 = inlined_call_operand.vmem [shape: f32[1,1,256], index: 1, kind: input, shape index: {}]   ;;  %s3540_s2 = inlined_call_operand.vmem [shape: f32[1,8,16], index: 2, kind: input, shape index: {}]   ;;  %s3541_s3 = inlined_call_operand.vmem [shape: bf16[64,32], index: 3, kind: input, shape index: {}]   ;;  %s3542_s4 = inlined_call_operand.vmem [shape: f32[64,1], index: 4, kind: input, shape index: {}]   ;;  %s3543_s5 = inlined_call_operand.vmem [shape: bf16[64,64], index: 5, kind: input, shape index: {}]   ;;  %s3544_s6 = inlined_call_operand.vmem [shape: f32[64,1], index: 6, kind: input, shape index: {}]   ;;  %s3545_s7 = inlined_call_operand.vmem [shape: bf16[128,64], index: 7, kind: input, shape index: {}]   ;;  %s3546_s8 = inlined_call_operand.vmem [shape: f32[128,1], index: 8, kind: input, shape index: {}]   ;;  %s3547_s9 = inlined_call_operand.vmem [shape: bf16[16,128], index: 9, kind: input, shape index: {}]   ;;  %s3548_s10 = inlined_call_operand.vmem [shape: f32[16,1], index: 10, kind: input, shape index: {}]   ;;  %s3549_s11 = inlined_call_operand.vmem [shape: bf16[128,16], index: 11, kind: input, shape index: {}]   ;;  %s3550_s12 = inlined_call_operand.vmem [shape: f32[128,1], index: 12, kind: input, shape index: {}]   ;;  %s3551_s13 = inlined_call_operand.vmem [shape: bf16[64,128], index: 13, kind: input, shape index: {}]   ;;  %s3552_s14 = inlined_call_operand.vmem [shape: f32[64,1], index: 14, kind: input, shape index: {}]   ;;  %s3553_s15 = inlined_call_operand.vmem [shape: bf16[64,64], index: 15, kind: input, shape index: {}]   ;;  %s3554_s16 = inlined_call_operand.vmem [shape: f32[64,1], index: 16, kind: input, shape index: {}]   ;;  %s3555_s17 = inlined_call_operand.vmem [shape: bf16[32,64], index: 17, kind: input, shape index: {}]   ;;  %s3556_s18 = inlined_call_operand.vmem [shape: f32[32,1], index: 18, kind: input, shape index: {}]   ;;  %s3557_s19 = inlined_call_operand.vmem [shape: f32[1,32,256], index: 19, kind: output, shape index: {0}]   ;;  %s3558_s20 = inlined_call_operand.vmem [shape: f32[1,8,256], index: 20, kind: output, shape index: {1}]  }
   0x1   :  { %3565 = sst [smem:[#allocation8_spill]] %s3538_s0 }
   0x2   :  { %3566 = sst [smem:[#allocation9_spill]] %s3539_s1 }
   0x3   :  { %3567 = sst [smem:[#allocation10_spill]] %s3540_s2 }
   0x4   :  { %3568 = sst [smem:[#allocation11_spill]] %s3541_s3 }
   0x5   :  { %3569 = sst [smem:[#allocation12_spill]] %s3542_s4 }
   0x6   :  { %3570 = sst [smem:[#allocation13_spill]] %s3557_s19 }
   0x7   :  { %s3066_s1 = smov 0   ;;  %s3068_s22 = smov 0  }
   0x8   :  { %s3070_s23 = smov 0   ;;  %s3072_s24 = smov 0  }
   0x9   :  { %s3074_s2 = smov 0  }
   0xa LB: > { %3571 = sst [smem:[#allocation4_spill]] %s2943_s22  ;;  %s40_s25 = sadd.s32 1, %s2951_s24  ;;  %s2955_s2 = sphi %s3074_s2, %s31_s2   ;;  %s2951_s24 = sphi %s3072_s24, %s3586_s24   ;;  %s2947_s23 = sphi %s3070_s23, %s3585_s23   ;;  %s2943_s22 = sphi %s3068_s22, %s3584_s22   ;;  %s2939_s1 = sphi %s3066_s1, %s3583_s1  }
   0xb   : > { %3572 = sst [smem:[#allocation5_spill]] %s2951_s24  ;;  %s2521_s3 = sadd.s32 4294967295, %s2955_s2  }
   0xc   : > { %p41_p0 = scmp.ge.s32.totalorder %s40_s25, 2  ;;  %p59_p1 = scmp.ne.s32.totalorder %s2943_s22, %s2939_s1 }
   0xd   : > { %p60_p2 = scmp.eq.s32.totalorder %s2955_s2, 0  ;;  %p481_p4 = scmp.eq.s32.totalorder %s2521_s3, 1 }
   0xe   : > { %s3588_s25 = smov (%p41_p0, %s40_s25), 0  ;;  %s52_s27 = sadd.s32 1, %s2943_s22 }
   0xf   : > { %3573 = sst [smem:[#allocation6_spill]] %s3588_s25  ;;  %p61_p3 = por %p60_p2, %p59_p1 }
  0x10   : > { %s48_s26 = ssub.s32 %s2951_s24, %s3588_s25  ;;  %p3101_p6 = por %p481_p4, %p59_p1 }
  0x11   : > { %p50_p5 = scmp.eq.s32.totalorder %s48_s26, 0  ;;  %p2525_p7 = scmp.ge.s32.totalorder %s2955_s2, 2 }
  0x13   : > { %s3106_s4 = scalar_select %p50_p5, %s2943_s22, %s52_s27  }
  0x14   : > { %586 = sbr.rel (%p2525_p7) target bundleno = 39 (0x27), region = 84 }
  0x15   : > { %3575 = sst [smem:[#allocation7_spill]] %s3106_s4 }
  0x1b   : > { %589 = sbr.rel (!%p61_p3) target bundleno = 39 (0x27), region = 88  ;;  %s591_s29 = sand.u32 (%p61_p3), 1, %s2943_s22  }
  0x1c   : > { %s2527_s30 = sshll.u32 (%p61_p3), %s2951_s24, 2  ;;  %s2526_s0 = sshll.u32 (%p61_p3), %s591_s29, 4 }
  0x1d   : > { %s3576_s25 = sld [smem:[#allocation8_spill]] (%p61_p3)  ;;  %s593_s26 = scalar_lea.vmem (%p61_p3), [#allocation2], %s2526_s0 }
  0x23   : > { %s597_s19 = scalar_lea.vmem %s3576_s25, %s2527_s30 }
  0x24   : > { %v613_v0 = vld [vmem:[%s597_s19] sm:$0xf]  ;;  %v615_v1 = vld [vmem:[%s597_s19 + $0x8] sm:$0xf]  ;;  %v617_v2 = vld [vmem:[%s597_s19 + $0x10] sm:$0xf] }
  0x25   : > { %614 = vst [vmem:[%s593_s26] sm:$0xf] %v613_v0  ;;  %616 = vst [vmem:[%s593_s26 + $0x4] sm:$0xf] %v615_v1  ;;  %v619_v3 = vld [vmem:[%s597_s19 + $0x18] sm:$0xf] }
  0x26   : > { %618 = vst [vmem:[%s593_s26 + $0x8] sm:$0xf] %v617_v2  ;;  %620 = vst [vmem:[%s593_s26 + $0xc] sm:$0xf] %v619_v3 }
  0x27 PF: > { %p2528_p8 = scmp.ge.s32.totalorder %s2955_s2, 1  ;;  %p660_p9 = scmp.lt.s32.totalorder %s2955_s2, 3 }
  0x29   : > { %p661_p10 = pnand %p2528_p8, %p660_p9 }
  0x2a   : > { %s3577_s25 = sld [smem:[#allocation12_spill]] (!%p661_p10)  ;;  %s3563_s19 = sand.u32 (!%p661_p10), 1, %s2939_s1   ;;  %v2957_v6 = vmov (!%p661_p10), 0   ;;  %vm854_vm0 = vcmask (!%p661_p10), 261120   ;;  %v953_v18 = vld [vmem:[%s3544_s6 + $0x8] sm:$0xff] (!%p661_p10)  ;;  %v952_v19 = vld [vmem:[%s3544_s6] sm:$0xff] (!%p661_p10) }
  0x2b   : > { %664 = sbr.rel (%p661_p10) target bundleno = 1955 (0x7a3), region = 133  ;;  %2875 = vset.pattern.permute.xlu1 (!%p661_p10), %v2957_v6  ;;  %2874 = vset.pattern.permute.xlu0 (!%p661_p10), %v2957_v6  ;;  %s2529_s27 = sshll.u32 (!%p661_p10), %s3563_s19, 4  ;;  %v955_v20 = vld [vmem:[%s3544_s6 + $0x18] sm:$0xff] (!%p661_p10)  ;;  %v954_v21 = vld [vmem:[%s3544_s6 + $0x10] sm:$0xff] (!%p661_p10)  ;;  %v957_v23 = vld [vmem:[%s3544_s6 + $0x28] sm:$0xff] (!%p661_p10)  ;;  %vm1020_vm1 = vcmask (!%p661_p10), 523264  }
  0x2c   : > { %s3578_s0 = sld [smem:[#allocation11_spill]] (!%p661_p10)  ;;  %s669_s4 = scalar_lea.vmem (!%p661_p10), [#allocation2], %s2529_s27  ;;  %v956_v24 = vld [vmem:[%s3544_s6 + $0x20] sm:$0xff] (!%p661_p10)  ;;  %v959_v25 = vld [vmem:[%s3544_s6 + $0x38] sm:$0xff] (!%p661_p10)  ;;  %v958_v26 = vld [vmem:[%s3544_s6 + $0x30] sm:$0xff] (!%p661_p10)  ;;  %vm2959_vm2 = vmmov (!%p661_p10), 0  }
  0x2d   : > { %v2876_v10 = vld [vmem:[%s669_s4] sm:$0xff] (!%p661_p10)   ;;  %v2877_v11 = vld [vmem:[%s669_s4 + $0x8] sm:$0xff] (!%p661_p10)   ;;  %vm1621_vm3 = vcmask (!%p661_p10), 130048   ;;  %s3579_s27 = sld [smem:[#allocation10_spill]] (!%p661_p10)  ;;  %p744_p11 = scmp.lt.s32.totalorder (!%p661_p10), %s2947_s23, 1 }
  0x2e   : > { %2678 = vmatprep.subr.bf16.mxu0 (!%p661_p10), %v2876_v10  ;;  %v1127_v27 = vld [vmem:[%s3546_s8 + $0x8] sm:$0xff] (!%p661_p10)  ;;  %v1126_v28 = vld [vmem:[%s3546_s8] sm:$0xff] (!%p661_p10)  ;;  %v1129_v29 = vld [vmem:[%s3546_s8 + $0x18] sm:$0xff] (!%p661_p10)  ;;  %s3580_s3 = sld [smem:[#allocation9_spill]] (!%p661_p10)  ;;  %s3581_s19 = sand.u32 (!%p661_p10), 1, %s2939_s1  }
  0x2f   : > { %2679 = vmatpush3.bf16.msra.mxu0 (!%p661_p10), %v2876_v10  ;;  %v1128_v30 = vld [vmem:[%s3546_s8 + $0x10] sm:$0xff] (!%p661_p10)  ;;  %v1131_v31 = vld [vmem:[%s3546_s8 + $0x28] sm:$0xff] (!%p661_p10)  ;;  %v1130_v32 = vld [vmem:[%s3546_s8 + $0x20] sm:$0xff] (!%p661_p10)  ;;  %s2530_s29 = sshll.u32 (!%p661_p10), %s3581_s19, 5 }
  0x30   : > { %v776_v4 = vld [vmem:[%s3577_s25 + $0x10] sm:$0xff] (!%p661_p10)  ;;  %v774_v5 = vld [vmem:[%s3577_s25] sm:$0xff] (!%p661_p10)  ;;  %v777_v7 = vld [vmem:[%s3577_s25 + $0x18] sm:$0xff] (!%p661_p10)  ;;  %2680 = vmatprep.subr.bf16.mxu0 (!%p661_p10), %v2877_v11  ;;  %s731_s22 = scalar_lea.vmem (!%p661_p10), [#allocation3], %s2530_s29 }
  0x31   : > { %v775_v8 = vld [vmem:[%s3577_s25 + $0x8] sm:$0xff] (!%p661_p10)  ;;  %794 = vperm.xlu1 (!%p661_p10), %2875, %v776_v4   ;;  %784 = vperm.xlu0 (!%p661_p10), %2874, %v774_v5   ;;  %v778_v13 = vld [vmem:[%s3577_s25 + $0x20] sm:$0xff] (!%p661_p10)  ;;  %v781_v14 = vld [vmem:[%s3577_s25 + $0x38] sm:$0xff] (!%p661_p10) }
  0x32   : > { %v2878_v9 = vld [vmem:[%s3578_s0] sm:$0xff]   ;;  %v779_v12 = vld [vmem:[%s3577_s25 + $0x28] sm:$0xff]  ;;  %v780_v15 = vld [vmem:[%s3577_s25 + $0x30] sm:$0xff]  ;;  %s3420_s30 = scalar_select %p744_p11, %s2947_s23, 1 }
  0x33   : > { %2682 = vmatprep.mubr.msk.bf16.mxu0 %vm854_vm0, %v2878_v9  ;;  %2681 = vmatpush3.bf16.msra.mxu0 %v2877_v11  ;;  %v2879_v16 = vld [vmem:[%s3578_s0 + $0x8] sm:$0xff]   ;;  %v2880_v17 = vld [vmem:[%s3578_s0 + $0x10] sm:$0xff]   ;;  %v2881_v22 = vld [vmem:[%s3578_s0 + $0x18] sm:$0xff]   ;;  %s2602_s1 = sshll.u32 (%p3101_p6), %s2947_s23, 3  ;;  %s3582_s24 = sld [smem:[#allocation13_spill]] (%p3101_p6) }
  0x34   : > { %v1133_v33 = vld [vmem:[%s3546_s8 + $0x38] sm:$0xff]  ;;  %v1132_v34 = vld [vmem:[%s3546_s8 + $0x30] sm:$0xff]  ;;  %v1135_v35 = vld [vmem:[%s3546_s8 + $0x48] sm:$0xff]  ;;  %s748_s26 = scalar_lea.vmem %s3580_s3, %s3420_s30  ;;  %s2531_s3 = sshll.u32 %s3420_s30, 3 }
  0x35   : > { %799 = vperm.xlu1 %2875, %v777_v7   ;;  %789 = vperm.xlu0 %2874, %v775_v8   ;;  %v1134_v36 = vld [vmem:[%s3546_s8 + $0x40] sm:$0xff]  ;;  %v1137_v37 = vld [vmem:[%s3546_s8 + $0x58] sm:$0xff]  ;;  %v1136_v38 = vld [vmem:[%s3546_s8 + $0x50] sm:$0xff]  ;;  %s760_s4 = scalar_lea.vmem %s3558_s20, %s2531_s3 }
  0x36   : > { %2683 = vmatmul.mubr.msk.bf16.vlgmr.msra.gmra.mrb[0].mxu0 %vm854_vm0, %v2879_v16  ;;  %v1139_v39 = vld [vmem:[%s3546_s8 + $0x68] sm:$0xff]  ;;  %v1138_v40 = vld [vmem:[%s3546_s8 + $0x60] sm:$0xff]  ;;  %v1141_v41 = vld [vmem:[%s3546_s8 + $0x78] sm:$0xff] }
  0x37   : > { %2686 = vmatprep.mubr.msk.bf16.mxu0 %vm854_vm0, %v2880_v17  ;;  %v1140_v42 = vld [vmem:[%s3546_s8 + $0x70] sm:$0xff]  ;;  %v1410_v43 = vld [vmem:[%s3548_s10 + $0x8] sm:$0xff]  ;;  %v1409_v44 = vld [vmem:[%s3548_s10] sm:$0xff] }
  0x38   : > { %v1486_v45 = vld [vmem:[%s3550_s12 + $0x8] sm:$0xff]  ;;  %v1485_v46 = vld [vmem:[%s3550_s12] sm:$0xff]  ;;  %v1488_v47 = vld [vmem:[%s3550_s12 + $0x18] sm:$0xff] }
  0x39   : > { %809 = vperm.xlu1 %2875, %v779_v12   ;;  %804 = vperm.xlu0 %2874, %v778_v13   ;;  %v1487_v48 = vld [vmem:[%s3550_s12 + $0x10] sm:$0xff]  ;;  %v1490_v49 = vld [vmem:[%s3550_s12 + $0x28] sm:$0xff]  ;;  %v1489_v50 = vld [vmem:[%s3550_s12 + $0x20] sm:$0xff]  ;;  %s2338_s3 = scalar_lea.vmem (%p3101_p6), %s3582_s24, %s2602_s1 }
  0x3a   : > { %v1492_v51 = vld [vmem:[%s3550_s12 + $0x38] sm:$0xff]  ;;  %v1491_v52 = vld [vmem:[%s3550_s12 + $0x30] sm:$0xff]  ;;  %v1494_v53 = vld [vmem:[%s3550_s12 + $0x48] sm:$0xff] }
  0x3b   : > { %v1493_v54 = vld [vmem:[%s3550_s12 + $0x40] sm:$0xff]  ;;  %v1496_v55 = vld [vmem:[%s3550_s12 + $0x58] sm:$0xff]  ;;  %v1495_v56 = vld [vmem:[%s3550_s12 + $0x50] sm:$0xff] }
  0x3c   : > { %v1498_v57 = vld [vmem:[%s3550_s12 + $0x68] sm:$0xff]  ;;  %v1497_v58 = vld [vmem:[%s3550_s12 + $0x60] sm:$0xff]  ;;  %v1500_v59 = vld [vmem:[%s3550_s12 + $0x78] sm:$0xff] }
  0x3d   : > { %819 = vperm.xlu1 %2875, %v781_v14   ;;  %814 = vperm.xlu0 %2874, %v780_v15   ;;  %v1499_v60 = vld [vmem:[%s3550_s12 + $0x70] sm:$0xff]  ;;  %v1776_v61 = vld [vmem:[%s3552_s14 + $0x8] sm:$0xff]  ;;  %v1775_v62 = vld [vmem:[%s3552_s14] sm:$0xff] }
  0x3e   : > { %2687 = vmatmul.mubr.msk.bf16.gmra.mrb[4].mxu0 %vm854_vm0, %v2881_v22  ;;  %v1778_v63 = vld [vmem:[%s3552_s14 + $0x18] sm:$0xff]  ;;  %v1777_v0 = vld [vmem:[%s3552_s14 + $0x10] sm:$0xff]  ;;  %v1780_v1 = vld [vmem:[%s3552_s14 + $0x28] sm:$0xff] }
  0x3f   : > { %v1779_v2 = vld [vmem:[%s3552_s14 + $0x20] sm:$0xff]  ;;  %v1782_v3 = vld [vmem:[%s3552_s14 + $0x38] sm:$0xff]  ;;  %v1781_v4 = vld [vmem:[%s3552_s14 + $0x30] sm:$0xff] }
  0x40   : > { %v1933_v5 = vld [vmem:[%s3554_s16 + $0x8] sm:$0xff]  ;;  %v1932_v6 = vld [vmem:[%s3554_s16] sm:$0xff]  ;;  %v1935_v7 = vld [vmem:[%s3554_s16 + $0x18] sm:$0xff] }
  0x41   : > { %967 = vperm.xlu1 %2875, %v953_v18   ;;  %962 = vperm.xlu0 %2874, %v952_v19   ;;  %v1934_v8 = vld [vmem:[%s3554_s16 + $0x10] sm:$0xff]  ;;  %v2882_v9 = vld [vmem:[%s3543_s5] sm:$0xff]   ;;  %v1937_v10 = vld [vmem:[%s3554_s16 + $0x28] sm:$0xff] }
  0x42   : > { %v1936_v11 = vld [vmem:[%s3554_s16 + $0x20] sm:$0xff]  ;;  %2698 = vmatprep.mubr.msk.bf16.mxu1 %vm1020_vm1, %v2882_v9  ;;  %v1939_v12 = vld [vmem:[%s3554_s16 + $0x38] sm:$0xff]  ;;  %v1938_v13 = vld [vmem:[%s3554_s16 + $0x30] sm:$0xff] }
  0x43   : > { %v2093_v14 = vld [vmem:[%s3556_s18] sm:$0xff]  ;;  %v2094_v15 = vld [vmem:[%s3556_s18 + $0x8] sm:$0xff]  ;;  %v2095_v16 = vld [vmem:[%s3556_s18 + $0x10] sm:$0xff] }
  0x44   : > { %v2096_v17 = vld [vmem:[%s3556_s18 + $0x18] sm:$0xff] }
  0x45   : > { %977 = vperm.xlu1 %2875, %v955_v20   ;;  %972 = vperm.xlu0 %2874, %v954_v21  }
  0x49   : > { %987 = vperm.xlu1 %2875, %v957_v23   ;;  %982 = vperm.xlu0 %2874, %v956_v24  }
  0x4d   : > { %997 = vperm.xlu1 %2875, %v959_v25   ;;  %992 = vperm.xlu0 %2874, %v958_v26  }
  0x51   : > { %1149 = vperm.xlu1 %2875, %v1127_v27   ;;  %1144 = vperm.xlu0 %2874, %v1126_v28  }
  0x55   : > { %1159 = vperm.xlu1 %2875, %v1129_v29   ;;  %1154 = vperm.xlu0 %2874, %v1128_v30  }
  0x59   : > { %1169 = vperm.xlu1 %2875, %v1131_v31   ;;  %1164 = vperm.xlu0 %2874, %v1130_v32  }
  0x5d   : > { %1179 = vperm.xlu1 %2875, %v1133_v33   ;;  %1174 = vperm.xlu0 %2874, %v1132_v34  }
  0x61   : > { %1189 = vperm.xlu1 %2875, %v1135_v35   ;;  %1184 = vperm.xlu0 %2874, %v1134_v36  }
  0x65   : > { %1199 = vperm.xlu1 %2875, %v1137_v37   ;;  %1194 = vperm.xlu0 %2874, %v1136_v38  }
  0x69   : > { %1209 = vperm.xlu1 %2875, %v1139_v39   ;;  %1204 = vperm.xlu0 %2874, %v1138_v40  }
  0x6d   : > { %1219 = vperm.xlu1 %2875, %v1141_v41   ;;  %1214 = vperm.xlu0 %2874, %v1140_v42  }
  0x71   : > { %1418 = vperm.xlu1 %2875, %v1410_v43   ;;  %1413 = vperm.xlu0 %2874, %v1409_v44  }
  0x75   : > { %1508 = vperm.xlu1 %2875, %v1486_v45   ;;  %1503 = vperm.xlu0 %2874, %v1485_v46  }
  0x79   : > { %1518 = vperm.xlu1 %2875, %v1488_v47   ;;  %1513 = vperm.xlu0 %2874, %v1487_v48  }
  0x7d   : > { %1528 = vperm.xlu1 %2875, %v1490_v49   ;;  %1523 = vperm.xlu0 %2874, %v1489_v50  }
  0x81   : > { %1538 = vperm.xlu1 %2875, %v1492_v51   ;;  %1533 = vperm.xlu0 %2874, %v1491_v52  }
  0x85   : > { %1548 = vperm.xlu1 %2875, %v1494_v53   ;;  %1543 = vperm.xlu0 %2874, %v1493_v54   ;;  %v2883_v54 = vld [vmem:[%s3543_s5 + $0x8] sm:$0xff]  }
  0x89   : > { %1558 = vperm.xlu1 %2875, %v1496_v55   ;;  %1553 = vperm.xlu0 %2874, %v1495_v56   ;;  %v2884_v55 = vld [vmem:[%s3543_s5 + $0x10] sm:$0xff]   ;;  %v2885_v56 = vld [vmem:[%s3543_s5 + $0x18] sm:$0xff]  }
  0x8d   : > { %1568 = vperm.xlu1 %2875, %v1498_v57   ;;  %1563 = vperm.xlu0 %2874, %v1497_v58   ;;  %v2886_v57 = vld [vmem:[%s3545_s7] sm:$0xff]  }
  0x8e   : > { %2714 = vmatprep.mubr.msk.bf16.mxu0 %vm1020_vm1, %v2886_v57 }
  0x91   : > { %1578 = vperm.xlu1 %2875, %v1500_v59   ;;  %1573 = vperm.xlu0 %2874, %v1499_v60  }
  0x95   : > { %1790 = vperm.xlu1 %2875, %v1776_v61   ;;  %1785 = vperm.xlu0 %2874, %v1775_v62  }
  0x99   : > { %1800 = vperm.xlu1 %2875, %v1778_v63   ;;  %1795 = vperm.xlu0 %2874, %v1777_v0  }
  0x9d   : > { %1810 = vperm.xlu1 %2875, %v1780_v1   ;;  %1805 = vperm.xlu0 %2874, %v1779_v2  }
  0xa1   : > { %1820 = vperm.xlu1 %2875, %v1782_v3   ;;  %1815 = vperm.xlu0 %2874, %v1781_v4  }
  0xa5   : > { %1947 = vperm.xlu1 %2875, %v1933_v5   ;;  %1942 = vperm.xlu0 %2874, %v1932_v6  }
  0xa9   : > { %1957 = vperm.xlu1 %2875, %v1935_v7   ;;  %1952 = vperm.xlu0 %2874, %v1934_v8  }
  0xad   : > { %1967 = vperm.xlu1 %2875, %v1937_v10   ;;  %1962 = vperm.xlu0 %2874, %v1936_v11  }
  0xb0   : > { %v785_v18 = vpop.permute.xlu0 %784  ;;  %v795_v19 = vpop.permute.xlu1 %794 }
  0xb1   : > { %1977 = vperm.xlu1 %2875, %v1939_v12   ;;  %1972 = vperm.xlu0 %2874, %v1938_v13  }
  0xb4   : > { %v790_v20 = vpop.permute.xlu0 %789  ;;  %v800_v21 = vpop.permute.xlu1 %799 }
  0xb5   : > { %2099 = vperm.xlu1 %2875, %v2093_v14  }
  0xb8   : > { %v805_v25 = vpop.permute.xlu0 %804  ;;  %v810_v30 = vpop.permute.xlu1 %809 }
  0xb9   : > { %2104 = vperm.xlu1 %2875, %v2094_v15  }
  0xbc   : > { %v815_v37 = vpop.permute.xlu0 %814  ;;  %v820_v42 = vpop.permute.xlu1 %819 }
  0xbd   : > { %2109 = vperm.xlu1 %2875, %v2095_v16  }
  0xc0   : > { %v963_v58 = vpop.permute.xlu0 %962  ;;  %v968_v59 = vpop.permute.xlu1 %967 }
  0xc1   : > { %2114 = vperm.xlu1 %2875, %v2096_v17  }
  0xc4   : > { %v973_v60 = vpop.permute.xlu0 %972  ;;  %v978_v61 = vpop.permute.xlu1 %977 }
  0xc8   : > { %v983_v1 = vpop.permute.xlu0 %982  ;;  %v988_v6 = vpop.permute.xlu1 %987 }
  0xcc   : > { %v993_v13 = vpop.permute.xlu0 %992 }
 0x109   : > { %v2684_v22 = vpop.f32.mrb[0].mxu0 }
 0x10a   : > { %v910_v23 = vadd.f32 %v2684_v22, %v795_v19  ;;  %v901_v24 = vpop.f32.mrb[1].mxu0 }
 0x10b   : > { %v902_v26 = vadd.f32 %v901_v24, %v785_v18  ;;  %v2685_v27 = vpop.f32.mrb[2].mxu0  ;;  %v998_v18 = vpop.permute.xlu1 %997 }
 0x10c   : > { %v913_v28 = vadd.f32 %v2685_v27, %v800_v21  ;;  %v904_v29 = vpop.f32.mrb[3].mxu0  ;;  %v934_v32 = vmax.f32 %v910_v23, 0.0 }
 0x10d   : > { %v905_v31 = vadd.f32 %v904_v29, %v790_v20  ;;  %v932_v34 = vmax.f32 %v902_v26, 0.0 }
 0x10e   : > { %v935_v33 = vmax.f32 %v913_v28, 0.0 }
 0x10f   : > { %v933_v35 = vmax.f32 %v905_v31, 0.0  ;;  %v2888_v31 = vld [vmem:[%s3545_s7 + $0x10] sm:$0xff]  }
 0x110   : > { %v941_v36 = vpack.c.bf16 %v935_v33, %v934_v32  ;;  %v2889_v32 = vld [vmem:[%s3545_s7 + $0x18] sm:$0xff]   ;;  %v2890_v33 = vld [vmem:[%s3545_s7 + $0x20] sm:$0xff]  }
 0x111   : > { %v2688_v38 = vpop.f32.mrb[4].mxu0  ;;  %v940_v39 = vpack.c.bf16 %v933_v35, %v932_v34  ;;  %v2891_v34 = vld [vmem:[%s3545_s7 + $0x28] sm:$0xff]   ;;  %v2892_v35 = vld [vmem:[%s3545_s7 + $0x30] sm:$0xff]  }
 0x112   : > { %v926_v40 = vadd.f32 %v2688_v38, %v815_v37  ;;  %v917_v41 = vpop.f32.mrb[5].mxu0  ;;  %v2958_v37 = vmov 0.0   ;;  %v3399_v38 = vld [vmem:[%s3579_s27] sm:$0xff] }
 0x113   : > { %v918_v43 = vadd.f32 %v917_v41, %v805_v25  ;;  %v2689_v44 = vpop.f32.mrb[6].mxu0  ;;  %2690 = vmatprep.subr.bf16.mxu1 %v940_v39  ;;  %v1145_v41 = vpop.permute.xlu0 %1144 }
 0x114   : > { %v929_v45 = vadd.f32 %v2689_v44, %v820_v42  ;;  %v920_v46 = vpop.f32.mrb[7].mxu0  ;;  %2691 = vmatpush3.bf16.msra.mxu1 %v940_v39  ;;  %v938_v48 = vmax.f32 %v926_v40, 0.0  ;;  %v2229_v39 = vmul.f32 %v3399_v38, %v3399_v38  ;;  %v1150_v42 = vpop.permute.xlu1 %1149 }
 0x115   : > { %v921_v47 = vadd.f32 %v920_v46, %v810_v30  ;;  %2692 = vmatprep.subr.bf16.mxu1 %v941_v36  ;;  %v936_v50 = vmax.f32 %v918_v43, 0.0  ;;  %v2887_v30 = vld [vmem:[%s3545_s7 + $0x8] sm:$0xff]  }
 0x116   : > { %v939_v49 = vmax.f32 %v929_v45, 0.0  ;;  %v2230_v40 = vsel %vm1621_vm3, %v2229_v39, 0.0 }
 0x117   : > { %v937_v51 = vmax.f32 %v921_v47, 0.0  ;;  %2231 = vadd.xlane.f32.xlu0 %v2230_v40  ;;  %v1155_v43 = vpop.permute.xlu0 %1154 }
 0x118   : > { %v943_v52 = vpack.c.bf16 %v939_v49, %v938_v48  ;;  %2693 = vmatpush3.bf16.msra.mxu1 %v941_v36  ;;  %v2893_v36 = vld [vmem:[%s3545_s7 + $0x38] sm:$0xff]   ;;  %v1160_v44 = vpop.permute.xlu1 %1159 }
 0x119   : > { %v942_v53 = vpack.c.bf16 %v937_v51, %v936_v50 }
 0x11b   : > { %2694 = vmatprep.subr.bf16.mxu1 %v942_v53  ;;  %v1165_v45 = vpop.permute.xlu0 %1164 }
 0x11c   : > { %2695 = vmatpush3.bf16.msra.mxu1 %v942_v53  ;;  %v1170_v46 = vpop.permute.xlu1 %1169 }
 0x11d   : > { %2696 = vmatprep.subr.bf16.mxu1 %v943_v52 }
 0x11f   : > { %v1175_v47 = vpop.permute.xlu0 %1174 }
 0x120   : > { %2697 = vmatpush3.bf16.msra.mxu1 %v943_v52  ;;  %v1180_v51 = vpop.permute.xlu1 %1179 }
 0x121   : > { %2730 = vmatprep.subr.bf16.mxu1 %v2958_v37 }
 0x123   : > { %2699 = vmatmul.mubr.msk.bf16.vlgmr.msra.gmra.mrb[0].mxu1 %vm1020_vm1, %v2883_v54 }
 0x124   : > { %2702 = vmatprep.mubr.msk.bf16.mxu1 %vm1020_vm1, %v2884_v55 }
 0x12b   : > { %2703 = vmatmul.mubr.msk.bf16.gmra.mrb[4].mxu1 %vm1020_vm1, %v2885_v56 }
 0x12c   : > { %2746 = vmatprep.mubr.msk.bf16.mxu1 %vm2959_vm2, %v2958_v37 }
 0x1f6   : > { %v2700_v62 = vpop.f32.mrb[0].mxu1 }
 0x1f7   : > { %v1076_v63 = vadd.f32 %v2700_v62, %v973_v60  ;;  %v1067_v0 = vpop.f32.mrb[1].mxu1 }
 0x1f8   : > { %v1068_v2 = vadd.f32 %v1067_v0, %v963_v58  ;;  %v2701_v3 = vpop.f32.mrb[2].mxu1 }
 0x1f9   : > { %v1079_v4 = vadd.f32 %v2701_v3, %v978_v61  ;;  %v1070_v5 = vpop.f32.mrb[3].mxu1  ;;  %v1100_v8 = vmax.f32 %v1076_v63, 0.0  ;;  %v1190_v63 = vpop.permute.xlu1 %1189 }
 0x1fa   : > { %v1071_v7 = vadd.f32 %v1070_v5, %v968_v59  ;;  %v1098_v10 = vmax.f32 %v1068_v2, 0.0  ;;  %v1185_v59 = vpop.permute.xlu0 %1184 }
 0x1fb   : > { %v1101_v9 = vmax.f32 %v1079_v4, 0.0 }
 0x1fc   : > { %v1099_v11 = vmax.f32 %v1071_v7, 0.0 }
 0x1fd   : > { %v1107_v12 = vpack.c.bf16 %v1101_v9, %v1100_v8 }
 0x1fe   : > { %v1106_v14 = vpack.c.bf16 %v1099_v11, %v1098_v10  ;;  %v2704_v15 = vpop.f32.mrb[4].mxu1  ;;  %v1195_v8 = vpop.permute.xlu0 %1194 }
 0x1ff   : > { %v1092_v16 = vadd.f32 %v2704_v15, %v993_v13  ;;  %v1083_v17 = vpop.f32.mrb[5].mxu1 }
 0x200   : > { %v1084_v19 = vadd.f32 %v1083_v17, %v983_v1  ;;  %v2705_v20 = vpop.f32.mrb[6].mxu1  ;;  %2706 = vmatprep.subr.bf16.mxu0 %v1106_v14 }
 0x201   : > { %v1095_v21 = vadd.f32 %v2705_v20, %v998_v18  ;;  %v1086_v22 = vpop.f32.mrb[7].mxu1  ;;  %2707 = vmatpush3.bf16.msra.mxu0 %v1106_v14  ;;  %v1104_v24 = vmax.f32 %v1092_v16, 0.0 }
 0x202   : > { %v1087_v23 = vadd.f32 %v1086_v22, %v988_v6  ;;  %2708 = vmatprep.subr.bf16.mxu0 %v1107_v12  ;;  %v1102_v26 = vmax.f32 %v1084_v19, 0.0  ;;  %v1205_v20 = vpop.permute.xlu0 %1204 }
 0x203   : > { %v1105_v25 = vmax.f32 %v1095_v21, 0.0 }
 0x204   : > { %v1103_v27 = vmax.f32 %v1087_v23, 0.0 }
 0x205   : > { %v1109_v28 = vpack.c.bf16 %v1105_v25, %v1104_v24  ;;  %2709 = vmatpush3.bf16.msra.mxu0 %v1107_v12  ;;  %v1200_v12 = vpop.permute.xlu1 %1199 }
 0x206   : > { %v1108_v29 = vpack.c.bf16 %v1103_v27, %v1102_v26 }
 0x208   : > { %2710 = vmatprep.subr.bf16.mxu0 %v1108_v29 }
 0x209   : > { %2711 = vmatpush3.bf16.msra.mxu0 %v1108_v29  ;;  %v1210_v25 = vpop.permute.xlu1 %1209 }
 0x20a   : > { %2712 = vmatprep.subr.bf16.mxu0 %v1109_v28 }
 0x20d   : > { %2713 = vmatpush3.bf16.msra.mxu0 %v1109_v28  ;;  %v1220_v39 = vpop.permute.xlu1 %1219 }
 0x210   : > { %2715 = vmatmul.mubr.msk.bf16.vlgmr.msra.gmra.mrb[8].mxu0 %vm1020_vm1, %v2887_v30 }
 0x211   : > { %2718 = vmatprep.mubr.msk.bf16.mxu0 %vm1020_vm1, %v2888_v31 }
 0x218   : > { %2719 = vmatmul.mubr.msk.bf16.gmra.mrb[12].mxu0 %vm1020_vm1, %v2889_v32  ;;  %v1215_v32 = vpop.permute.xlu0 %1214 }
 0x219   : > { %2722 = vmatprep.mubr.msk.bf16.mxu0 %vm1020_vm1, %v2890_v33 }
 0x220   : > { %2723 = vmatmul.mubr.msk.bf16.gmra.mrb[16].mxu0 %vm1020_vm1, %v2891_v34 }
 0x221   : > { %2726 = vmatprep.mubr.msk.bf16.mxu0 %vm1020_vm1, %v2892_v35 }
 0x228   : > { %2727 = vmatmul.mubr.msk.bf16.gmra.mrb[20].mxu0 %vm1020_vm1, %v2893_v36 }
 0x2e3   : > { %v2716_v48 = vpop.f32.mrb[8].mxu0 }
 0x2e4   : > { %v1329_v49 = vadd.f32 %v2716_v48, %v1155_v43  ;;  %v1320_v50 = vpop.f32.mrb[9].mxu0 }
 0x2e5   : > { %v1321_v52 = vadd.f32 %v1320_v50, %v1145_v41  ;;  %v2717_v53 = vpop.f32.mrb[10].mxu0 }
 0x2e6   : > { %v1332_v54 = vadd.f32 %v2717_v53, %v1160_v44  ;;  %v1323_v55 = vpop.f32.mrb[11].mxu0  ;;  %v1385_v57 = vmax.f32 %v1329_v49, 0.0  ;;  %v1414_v53 = vpop.permute.xlu0 %1413 }
 0x2e7   : > { %v1324_v56 = vadd.f32 %v1323_v55, %v1150_v42  ;;  %v1383_v60 = vmax.f32 %v1321_v52, 0.0  ;;  %v2895_v52 = vld [vmem:[%s3549_s11] sm:$0xff]  }
 0x2e8   : > { %v1386_v58 = vmax.f32 %v1332_v54, 0.0  ;;  %2752 = vmatprep.mubr.msk.bf16.mxu0 %vm1621_vm3, %v2895_v52 }
 0x2e9   : > { %v1384_v61 = vmax.f32 %v1324_v56, 0.0 }
 0x2ea   : > { %v1400_v62 = vpack.c.bf16 %v1386_v58, %v1385_v57  ;;  %v1419_v57 = vpop.permute.xlu1 %1418  ;;  %v2599_v58 = vld [vmem:[%s748_s26] ss:$0 sm:$0xff] }
 0x2eb   : > { %v1399_v0 = vpack.c.bf16 %v1384_v61, %v1383_v60  ;;  %v2720_v1 = vpop.f32.mrb[12].mxu0 }
 0x2ec   : > { %v1345_v2 = vadd.f32 %v2720_v1, %v1175_v47  ;;  %v1336_v3 = vpop.f32.mrb[13].mxu0 }
 0x2ed   : > { %v1337_v4 = vadd.f32 %v1336_v3, %v1165_v45  ;;  %v2721_v5 = vpop.f32.mrb[14].mxu0  ;;  %2731 = vmatpush3.bf16.msra.mxu1 %v1399_v0  ;;  %v2897_v3 = vld [vmem:[%s3549_s11 + $0x10] sm:$0xff]  }
 0x2ee   : > { %v1348_v6 = vadd.f32 %v2721_v5, %v1180_v51  ;;  %v1339_v7 = vpop.f32.mrb[15].mxu0  ;;  %2732 = vmatprep.subr.bf16.mxu1 %v2958_v37  ;;  %v1389_v10 = vmax.f32 %v1345_v2, 0.0  ;;  %v2894_v51 = vld [vmem:[%s3547_s9] sm:$0xff]   ;;  %v2896_v2 = vld [vmem:[%s3549_s11 + $0x8] sm:$0xff]  }
 0x2ef   : > { %v1340_v9 = vadd.f32 %v1339_v7, %v1170_v46  ;;  %v1387_v13 = vmax.f32 %v1337_v4, 0.0 }
 0x2f0   : > { %v1390_v11 = vmax.f32 %v1348_v6, 0.0 }
 0x2f1   : > { %v1388_v14 = vmax.f32 %v1340_v9, 0.0  ;;  %2733 = vmatpush3.bf16.msra.mxu1 %v1400_v62  ;;  %v2899_v9 = vld [vmem:[%s3549_s11 + $0x20] sm:$0xff]  }
 0x2f2   : > { %v1402_v15 = vpack.c.bf16 %v1390_v11, %v1389_v10  ;;  %2734 = vmatprep.subr.bf16.mxu1 %v2958_v37 }
 0x2f3   : > { %v1401_v16 = vpack.c.bf16 %v1388_v14, %v1387_v13  ;;  %v2724_v17 = vpop.f32.mrb[16].mxu0 }
 0x2f4   : > { %v1361_v18 = vadd.f32 %v2724_v17, %v1195_v8  ;;  %v1352_v19 = vpop.f32.mrb[17].mxu0  ;;  %v2898_v8 = vld [vmem:[%s3549_s11 + $0x18] sm:$0xff]  }
 0x2f5   : > { %v1353_v21 = vadd.f32 %v1352_v19, %v1185_v59  ;;  %v2725_v22 = vpop.f32.mrb[18].mxu0  ;;  %2735 = vmatpush3.bf16.msra.mxu1 %v1401_v16  ;;  %v2901_v16 = vld [vmem:[%s3549_s11 + $0x30] sm:$0xff]  }
 0x2f6   : > { %v1364_v23 = vadd.f32 %v2725_v22, %v1200_v12  ;;  %v1355_v24 = vpop.f32.mrb[19].mxu0  ;;  %2736 = vmatprep.subr.bf16.mxu1 %v2958_v37  ;;  %v1393_v27 = vmax.f32 %v1361_v18, 0.0  ;;  %v2902_v22 = vld [vmem:[%s3549_s11 + $0x38] sm:$0xff]  }
 0x2f7   : > { %v1356_v26 = vadd.f32 %v1355_v24, %v1190_v63  ;;  %v1391_v29 = vmax.f32 %v1353_v21, 0.0 }
 0x2f8   : > { %v1394_v28 = vmax.f32 %v1364_v23, 0.0 }
 0x2f9   : > { %v1392_v30 = vmax.f32 %v1356_v26, 0.0  ;;  %2737 = vmatpush3.bf16.msra.mxu1 %v1402_v15  ;;  %v2900_v15 = vld [vmem:[%s3549_s11 + $0x28] sm:$0xff]  }
 0x2fa   : > { %v1404_v31 = vpack.c.bf16 %v1394_v28, %v1393_v27  ;;  %2738 = vmatprep.subr.bf16.mxu1 %v2958_v37 }
 0x2fb   : > { %v1403_v33 = vpack.c.bf16 %v1392_v30, %v1391_v29  ;;  %v2728_v34 = vpop.f32.mrb[20].mxu0 }
 0x2fc   : > { %v1377_v35 = vadd.f32 %v2728_v34, %v1215_v32  ;;  %v1368_v36 = vpop.f32.mrb[21].mxu0 }
 0x2fd   : > { %v1369_v40 = vadd.f32 %v1368_v36, %v1205_v20  ;;  %v2729_v41 = vpop.f32.mrb[22].mxu0  ;;  %2739 = vmatpush3.bf16.msra.mxu1 %v1403_v33  ;;  %v1504_v36 = vpop.permute.xlu0 %1503 }
 0x2fe   : > { %v1380_v42 = vadd.f32 %v2729_v41, %v1220_v39  ;;  %v1371_v43 = vpop.f32.mrb[23].mxu0  ;;  %2740 = vmatprep.subr.bf16.mxu1 %v2958_v37  ;;  %v1397_v45 = vmax.f32 %v1377_v35, 0.0  ;;  %v2903_v35 = vld [vmem:[%s3551_s13] sm:$0xff]   ;;  %v1509_v39 = vpop.permute.xlu1 %1508 }
 0x2ff   : > { %v1372_v44 = vadd.f32 %v1371_v43, %v1210_v25  ;;  %v1395_v47 = vmax.f32 %v1369_v40, 0.0 }
 0x300   : > { %v1398_v46 = vmax.f32 %v1380_v42, 0.0 }
 0x301   : > { %v1396_v48 = vmax.f32 %v1372_v44, 0.0  ;;  %2741 = vmatpush3.bf16.msra.mxu1 %v1404_v31  ;;  %v1514_v40 = vpop.permute.xlu0 %1513 }
 0x302   : > { %v1406_v49 = vpack.c.bf16 %v1398_v46, %v1397_v45  ;;  %2742 = vmatprep.subr.bf16.mxu1 %v2958_v37  ;;  %v1519_v41 = vpop.permute.xlu1 %1518 }
 0x303   : > { %v1405_v50 = vpack.c.bf16 %v1396_v48, %v1395_v47 }
 0x305   : > { %2743 = vmatpush3.bf16.msra.mxu1 %v1405_v50  ;;  %v1524_v42 = vpop.permute.xlu0 %1523 }
 0x306   : > { %2744 = vmatprep.subr.bf16.mxu1 %v2958_v37  ;;  %v1529_v43 = vpop.permute.xlu1 %1528 }
 0x309   : > { %2745 = vmatpush3.bf16.msra.mxu1 %v1406_v49  ;;  %v1534_v44 = vpop.permute.xlu0 %1533 }
 0x30a   : > { %v1539_v48 = vpop.permute.xlu1 %1538 }
 0x30c   : > { %2747 = vmatmul.mubr.bf16.vlgmr.msra.gmra.mrb[8].mxu1 %v2894_v51 }
 0x30d   : > { %2784 = vmatprep.mubr.bf16.mxu1 %v2903_v35 }
 0x3df   : > { %v1461_v54 = vpop.f32.mrb[8].mxu1 }
 0x3e0   : > { %v1462_v55 = vadd.f32 %v1461_v54, %v1414_v53  ;;  %v2748_v56 = vpop.f32.mrb[9].mxu1 }
 0x3e1   : > { %v1464_v59 = vpop.f32.mrb[10].mxu1  ;;  %v1544_v56 = vpop.permute.xlu0 %1543 }
 0x3e2   : > { %v1465_v60 = vadd.f32 %v1464_v59, %v1419_v57  ;;  %v2749_v61 = vpop.f32.mrb[11].mxu1  ;;  %v2193_v62 = vmul.f32 %v2599_v58, %v1462_v55 }
 0x3e4   : > { %v1468_v63 = vpack.c.bf16 %v1465_v60, %v1462_v55  ;;  %v2194_v0 = vmul.f32 %v2599_v58, %v1465_v60  ;;  %v1549_v60 = vpop.permute.xlu1 %1548 }
 0x3e6   : > { %v2195_v1 = vadd.f32 %v2194_v0, %v2193_v62  ;;  %2750 = vmatprep.subr.bf16.mxu0 %v1468_v63 }
 0x3e7   : > { %2751 = vmatpush3.bf16.msra.mxu0 %v1468_v63 }
 0x3e8   : > { %v2196_v4 = vrot.slane %v2195_v1, 4 }
 0x3ea   : > { %v2197_v5 = vadd.f32 %v2196_v4, %v2195_v1  ;;  %2753 = vmatmul.mubr.msk.bf16.vlgmr.msra.gmra.mrb[24].mxu0 %vm1621_vm3, %v2896_v2 }
 0x3eb   : > { %2756 = vmatprep.mubr.msk.bf16.mxu0 %vm1621_vm3, %v2897_v3 }
 0x3ec   : > { %v2198_v6 = vrot.slane %v2197_v5, 2 }
 0x3ee   : > { %v2199_v7 = vadd.f32 %v2198_v6, %v2197_v5  ;;  %v1554_v5 = vpop.permute.xlu0 %1553 }
 0x3f0   : > { %v2200_v10 = vrot.slane %v2199_v7, 1 }
 0x3f2   : > { %v2201_v11 = vadd.f32 %v2200_v10, %v2199_v7  ;;  %2757 = vmatmul.mubr.msk.bf16.gmra.mrb[28].mxu0 %vm1621_vm3, %v2898_v8 }
 0x3f3   : > { %2760 = vmatprep.mubr.msk.bf16.mxu0 %vm1621_vm3, %v2899_v9  ;;  %v1559_v9 = vpop.permute.xlu1 %1558 }
 0x3f4   : > { %v2203_v12 = vmul.f32 0.0625, %v2201_v11 }
 0x3f6   : > { %v2204_v13 = vsub.f32 %v2193_v62, %v2203_v12  ;;  %v2205_v14 = vsub.f32 %v2194_v0, %v2203_v12 }
 0x3f8   : > { %v2206_v17 = vmul.f32 %v2204_v13, %v2204_v13  ;;  %v2207_v18 = vmul.f32 %v2205_v14, %v2205_v14 }
 0x3fa   : > { %v2208_v19 = vadd.f32 %v2207_v18, %v2206_v17  ;;  %2761 = vmatmul.mubr.msk.bf16.gmra.mrb[32].mxu0 %vm1621_vm3, %v2900_v15  ;;  %v1564_v17 = vpop.permute.xlu0 %1563 }
 0x3fb   : > { %2764 = vmatprep.mubr.msk.bf16.mxu0 %vm1621_vm3, %v2901_v16 }
 0x3fc   : > { %v2209_v20 = vrot.slane %v2208_v19, 4 }
 0x3fe   : > { %v2210_v21 = vadd.f32 %v2209_v20, %v2208_v19 }
 0x400   : > { %v2211_v23 = vrot.slane %v2210_v21, 2 }
 0x402   : > { %v2212_v24 = vadd.f32 %v2211_v23, %v2210_v21  ;;  %2765 = vmatmul.mubr.msk.bf16.gmra.mrb[36].mxu0 %vm1621_vm3, %v2902_v22  ;;  %v1569_v22 = vpop.permute.xlu1 %1568 }
 0x404   : > { %v2213_v25 = vrot.slane %v2212_v24, 1 }
 0x406   : > { %v2214_v26 = vadd.f32 %v2213_v25, %v2212_v24 }
 0x408   : > { %v2215_v27 = vmul.f32 0.06666667, %v2214_v26 }
 0x40a   : > { %2913 = vrsqrt.f32 %v2215_v27 }
 0x414   : > { %v2914_v28 = vpop.eup %2913 }
 0x415   : > { %v3454_v29 = vmul.f32 %v2914_v28, %v2204_v13  ;;  %v3456_v30 = vmul.f32 %v2914_v28, %v2205_v14 }
 0x417   : > { %v2221_v31 = vmul.f32 %v3456_v30, %v3456_v30  ;;  %v2220_v32 = vmul.f32 %v3454_v29, %v3454_v29  ;;  %v2828_v33 = vpack.c.bf16 %v3456_v30, %v3454_v29 }
 0x419   : > { %v3464_v34 = vadd.f32 %v2221_v31, %v2220_v32  ;;  %v1574_v31 = vpop.permute.xlu0 %1573 }
 0x4bd   : > { %v2754_v45 = vpop.f32.mrb[24].mxu0 }
 0x4be   : > { %v1689_v46 = vadd.f32 %v2754_v45, %v1514_v40  ;;  %v1680_v47 = vpop.f32.mrb[25].mxu0  ;;  %v1579_v40 = vpop.permute.xlu1 %1578 }
 0x4bf   : > { %v1681_v49 = vadd.f32 %v1680_v47, %v1504_v36  ;;  %v2755_v50 = vpop.f32.mrb[26].mxu0 }
 0x4c0   : > { %v1692_v51 = vadd.f32 %v2755_v50, %v1519_v41  ;;  %v1683_v52 = vpop.f32.mrb[27].mxu0  ;;  %v1745_v54 = vmax.f32 %v1689_v46, 0.0 }
 0x4c1   : > { %v1684_v53 = vadd.f32 %v1683_v52, %v1509_v39  ;;  %v1743_v57 = vmax.f32 %v1681_v49, 0.0  ;;  %v2904_v52 = vld [vmem:[%s3551_s13 + $0x8] sm:$0xff]  }
 0x4c2   : > { %v1746_v55 = vmax.f32 %v1692_v51, 0.0 }
 0x4c3   : > { %v1744_v58 = vmax.f32 %v1684_v53, 0.0  ;;  %v2905_v53 = vld [vmem:[%s3551_s13 + $0x10] sm:$0xff]  }
 0x4c4   : > { %v1760_v59 = vpack.c.bf16 %v1746_v55, %v1745_v54  ;;  %v2906_v54 = vld [vmem:[%s3551_s13 + $0x18] sm:$0xff]   ;;  %v2907_v55 = vld [vmem:[%s3553_s15] sm:$0xff]  }
 0x4c5   : > { %v1759_v61 = vpack.c.bf16 %v1744_v58, %v1743_v57  ;;  %v2758_v62 = vpop.f32.mrb[28].mxu0  ;;  %2800 = vmatprep.mubr.msk.bf16.mxu0 %vm1020_vm1, %v2907_v55  ;;  %v1791_v57 = vpop.permute.xlu1 %1790 }
 0x4c6   : > { %v1705_v63 = vadd.f32 %v2758_v62, %v1534_v44  ;;  %v1696_v0 = vpop.f32.mrb[29].mxu0 }
 0x4c7   : > { %v1697_v1 = vadd.f32 %v1696_v0, %v1524_v42  ;;  %v2759_v2 = vpop.f32.mrb[30].mxu0  ;;  %2768 = vmatprep.subr.bf16.mxu1 %v1759_v61 }
 0x4c8   : > { %v1708_v3 = vadd.f32 %v2759_v2, %v1539_v48  ;;  %v1699_v4 = vpop.f32.mrb[31].mxu0  ;;  %2769 = vmatpush3.bf16.msra.mxu1 %v1759_v61  ;;  %v1749_v7 = vmax.f32 %v1705_v63, 0.0 }
 0x4c9   : > { %v1700_v6 = vadd.f32 %v1699_v4, %v1529_v43  ;;  %2770 = vmatprep.subr.bf16.mxu1 %v1760_v59  ;;  %v1747_v10 = vmax.f32 %v1697_v1, 0.0 }
 0x4ca   : > { %v1750_v8 = vmax.f32 %v1708_v3, 0.0 }
 0x4cb   : > { %v1748_v11 = vmax.f32 %v1700_v6, 0.0 }
 0x4cc   : > { %v1762_v12 = vpack.c.bf16 %v1750_v8, %v1749_v7  ;;  %2771 = vmatpush3.bf16.msra.mxu1 %v1760_v59  ;;  %v1801_v59 = vpop.permute.xlu1 %1800 }
 0x4cd   : > { %v1761_v13 = vpack.c.bf16 %v1748_v11, %v1747_v10  ;;  %v2762_v14 = vpop.f32.mrb[32].mxu0 }
 0x4ce   : > { %v1721_v15 = vadd.f32 %v2762_v14, %v1554_v5  ;;  %v1712_v16 = vpop.f32.mrb[33].mxu0 }
 0x4cf   : > { %v1713_v18 = vadd.f32 %v1712_v16, %v1544_v56  ;;  %v2763_v19 = vpop.f32.mrb[34].mxu0  ;;  %2772 = vmatprep.subr.bf16.mxu1 %v1761_v13  ;;  %v1786_v56 = vpop.permute.xlu0 %1785 }
 0x4d0   : > { %v1724_v20 = vadd.f32 %v2763_v19, %v1559_v9  ;;  %v1715_v21 = vpop.f32.mrb[35].mxu0  ;;  %2773 = vmatpush3.bf16.msra.mxu1 %v1761_v13  ;;  %v1753_v24 = vmax.f32 %v1721_v15, 0.0  ;;  %v1811_v4 = vpop.permute.xlu1 %1810 }
 0x4d1   : > { %v1716_v23 = vadd.f32 %v1715_v21, %v1549_v60  ;;  %2774 = vmatprep.subr.bf16.mxu1 %v1762_v12  ;;  %v1751_v26 = vmax.f32 %v1713_v18, 0.0 }
 0x4d2   : > { %v1754_v25 = vmax.f32 %v1724_v20, 0.0 }
 0x4d3   : > { %v1752_v27 = vmax.f32 %v1716_v23, 0.0  ;;  %v1796_v58 = vpop.permute.xlu0 %1795 }
 0x4d4   : > { %v1764_v28 = vpack.c.bf16 %v1754_v25, %v1753_v24  ;;  %2775 = vmatpush3.bf16.msra.mxu1 %v1762_v12  ;;  %v1821_v16 = vpop.permute.xlu1 %1820 }
 0x4d5   : > { %v1763_v32 = vpack.c.bf16 %v1752_v27, %v1751_v26  ;;  %v2766_v35 = vpop.f32.mrb[36].mxu0 }
 0x4d6   : > { %v1737_v36 = vadd.f32 %v2766_v35, %v1574_v31  ;;  %v1728_v39 = vpop.f32.mrb[37].mxu0  ;;  %v2909_v31 = vld [vmem:[%s3553_s15 + $0x10] sm:$0xff]   ;;  %v2910_v35 = vld [vmem:[%s3553_s15 + $0x18] sm:$0xff]  }
 0x4d7   : > { %v1729_v41 = vadd.f32 %v1728_v39, %v1564_v17  ;;  %v2767_v42 = vpop.f32.mrb[38].mxu0  ;;  %2776 = vmatprep.subr.bf16.mxu1 %v1763_v32  ;;  %v1806_v63 = vpop.permute.xlu0 %1805 }
 0x4d8   : > { %v1740_v43 = vadd.f32 %v2767_v42, %v1579_v40  ;;  %v1731_v44 = vpop.f32.mrb[39].mxu0  ;;  %2777 = vmatpush3.bf16.msra.mxu1 %v1763_v32  ;;  %v1757_v46 = vmax.f32 %v1737_v36, 0.0  ;;  %v2960_v32 = vmov 0.0|0.0   ;;  %v2911_v36 = vld [vmem:[%s3555_s17] sm:$0xff]   ;;  %v1948_v30 = vpop.permute.xlu1 %1947 }
 0x4d9   : > { %v1732_v45 = vadd.f32 %v1731_v44, %v1569_v22  ;;  %2778 = vmatprep.subr.bf16.mxu1 %v1764_v28  ;;  %v1755_v48 = vmax.f32 %v1729_v41, 0.0 }
 0x4da   : > { %v1758_v47 = vmax.f32 %v1740_v43, 0.0 }
 0x4db   : > { %v1756_v49 = vmax.f32 %v1732_v45, 0.0  ;;  %v1816_v11 = vpop.permute.xlu0 %1815 }
 0x4dc   : > { %v1766_v50 = vpack.c.bf16 %v1758_v47, %v1757_v46  ;;  %2779 = vmatpush3.bf16.msra.mxu1 %v1764_v28  ;;  %v2908_v28 = vld [vmem:[%s3553_s15 + $0x8] sm:$0xff]   ;;  %v1958_v41 = vpop.permute.xlu1 %1957 }
 0x4dd   : > { %v1765_v51 = vpack.c.bf16 %v1756_v49, %v1755_v48 }
 0x4df   : > { %2780 = vmatprep.subr.bf16.mxu1 %v1765_v51  ;;  %v1943_v29 = vpop.permute.xlu0 %1942 }
 0x4e0   : > { %2781 = vmatpush3.bf16.msra.mxu1 %v1765_v51  ;;  %v1968_v49 = vpop.permute.xlu1 %1967 }
 0x4e1   : > { %2782 = vmatprep.subr.bf16.mxu1 %v1766_v50 }
 0x4e3   : > { %v1953_v39 = vpop.permute.xlu0 %1952 }
 0x4e4   : > { %2783 = vmatpush3.bf16.msra.mxu1 %v1766_v50 }
 0x4e7   : > { %2785 = vmatmul.mubr.bf16.vlgmr.msra.gmra.mrb[12].mxu1 %v2904_v52  ;;  %v1963_v45 = vpop.permute.xlu0 %1962 }
 0x4e8   : > { %2788 = vmatprep.mubr.bf16.mxu1 %v2905_v53 }
 0x4ef   : > { %2789 = vmatmul.mubr.bf16.gmra.mrb[16].mxu1 %v2906_v54 }
 0x4f0   : > { %2816 = vmatprep.mubr.msk.bf16.mxu1 %vm1020_vm1, %v2911_v36 }
 0x5ba   : > { %v2786_v60 = vpop.f32.mrb[12].mxu1 }
 0x5bb   : > { %v1890_v61 = vadd.f32 %v2786_v60, %v1796_v58  ;;  %v1881_v62 = vpop.f32.mrb[13].mxu1 }
 0x5bc   : > { %v1882_v0 = vadd.f32 %v1881_v62, %v1786_v56  ;;  %v2787_v1 = vpop.f32.mrb[14].mxu1  ;;  %v1978_v62 = vpop.permute.xlu1 %1977 }
 0x5bd   : > { %v1893_v2 = vadd.f32 %v2787_v1, %v1801_v59  ;;  %v1884_v3 = vpop.f32.mrb[15].mxu1  ;;  %v1914_v6 = vmax.f32 %v1890_v61, 0.0 }
 0x5be   : > { %v1885_v5 = vadd.f32 %v1884_v3, %v1791_v57  ;;  %v1912_v8 = vmax.f32 %v1882_v0, 0.0  ;;  %v1973_v57 = vpop.permute.xlu0 %1972 }
 0x5bf   : > { %v1915_v7 = vmax.f32 %v1893_v2, 0.0 }
 0x5c0   : > { %v1913_v9 = vmax.f32 %v1885_v5, 0.0 }
 0x5c1   : > { %v1921_v10 = vpack.c.bf16 %v1915_v7, %v1914_v6 }
 0x5c2   : > { %v1920_v12 = vpack.c.bf16 %v1913_v9, %v1912_v8  ;;  %v2790_v13 = vpop.f32.mrb[16].mxu1  ;;  %v2232_v7 = vpop.xlane.xlu0 %2231 }
 0x5c3   : > { %v1906_v14 = vadd.f32 %v2790_v13, %v1816_v11  ;;  %v1897_v15 = vpop.f32.mrb[17].mxu1 }
 0x5c4   : > { %v1898_v17 = vadd.f32 %v1897_v15, %v1806_v63  ;;  %v2791_v18 = vpop.f32.mrb[18].mxu1  ;;  %2792 = vmatprep.subr.bf16.mxu0 %v1920_v12 }
 0x5c5   : > { %v1909_v19 = vadd.f32 %v2791_v18, %v1821_v16  ;;  %v1900_v20 = vpop.f32.mrb[19].mxu1  ;;  %2793 = vmatpush3.bf16.msra.mxu0 %v1920_v12  ;;  %v1918_v22 = vmax.f32 %v1906_v14, 0.0  ;;  %v2912_v18 = vld [vmem:[%s3555_s17 + $0x8] sm:$0xff]  }
 0x5c6   : > { %v1901_v21 = vadd.f32 %v1900_v20, %v1811_v4  ;;  %2794 = vmatprep.subr.bf16.mxu0 %v1921_v10  ;;  %v1916_v24 = vmax.f32 %v1898_v17, 0.0 }
 0x5c7   : > { %v1919_v23 = vmax.f32 %v1909_v19, 0.0 }
 0x5c8   : > { %v1917_v25 = vmax.f32 %v1901_v21, 0.0 }
 0x5c9   : > { %v1923_v26 = vpack.c.bf16 %v1919_v23, %v1918_v22  ;;  %2795 = vmatpush3.bf16.msra.mxu0 %v1921_v10 }
 0x5ca   : > { %v1922_v27 = vpack.c.bf16 %v1917_v25, %v1916_v24 }
 0x5cc   : > { %2796 = vmatprep.subr.bf16.mxu0 %v1922_v27 }
 0x5cd   : > { %2797 = vmatpush3.bf16.msra.mxu0 %v1922_v27 }
 0x5ce   : > { %2798 = vmatprep.subr.bf16.mxu0 %v1923_v26 }
 0x5d1   : > { %2799 = vmatpush3.bf16.msra.mxu0 %v1923_v26 }
 0x5d2   : > { %2827 = vmatprep.subr.bf16.mxu0 %v2960_v32 }
 0x5d4   : > { %2801 = vmatmul.mubr.msk.bf16.vlgmr.msra.gmra.mrb[40].mxu0 %vm1020_vm1, %v2908_v28  ;;  %v2100_v28 = vpop.permute.xlu1 %2099 }
 0x5d5   : > { %2829 = vmatpush3.bf16.msra.mxu0 %v2828_v33  ;;  %2804 = vmatprep.mubr.msk.bf16.mxu0 %vm1020_vm1, %v2909_v31  ;;  %v2223_v33 = vrot.slane %v3464_v34, 4 }
 0x5d7   : > { %v2224_v40 = vadd.f32 %v2223_v33, %v3464_v34 }
 0x5d8   : > { %v2105_v31 = vpop.permute.xlu1 %2104 }
 0x5d9   : > { %v2225_v43 = vrot.slane %v2224_v40, 2 }
 0x5db   : > { %v2226_v51 = vadd.f32 %v2225_v43, %v2224_v40 }
 0x5dc   : > { %2805 = vmatmul.mubr.msk.bf16.gmra.mrb[44].mxu0 %vm1020_vm1, %v2910_v35  ;;  %v2110_v32 = vpop.permute.xlu1 %2109 }
 0x5dd   : > { %2824 = vmatprep.mubr.msk.f32.mxu0 %vm2959_vm2, %v2958_v37  ;;  %v2227_v59 = vrot.slane %v2226_v51, 1 }
 0x5df   : > { %v2228_v4 = vadd.f32 %v2227_v59, %v2226_v51 }
 0x5e1   : > { %v2233_v13 = vadd.f32 %v2232_v7, %v2228_v4 }
 0x5e4   : > { %2825 = vmatmul.mubr.msk.f32.vlgmr.msra.gmra.mrb[48].mxu0 %vm1621_vm3, %v3399_v38 }
 0x6a7   : > { %v2802_v42 = vpop.f32.mrb[40].mxu0 }
 0x6a8   : > { %v2055_v37 = vadd.f32 %v2802_v42, %v1953_v39  ;;  %v2046_v44 = vpop.f32.mrb[41].mxu0 }
 0x6a9   : > { %v2047_v38 = vadd.f32 %v2046_v44, %v1943_v29  ;;  %v2803_v46 = vpop.f32.mrb[42].mxu0 }
 0x6aa   : > { %v2058_v47 = vadd.f32 %v2803_v46, %v1958_v41  ;;  %v2049_v48 = vpop.f32.mrb[43].mxu0  ;;  %v2079_v52 = vmax.f32 %v2055_v37, 0.0 }
 0x6ab   : > { %v2050_v50 = vadd.f32 %v2049_v48, %v1948_v30  ;;  %v2077_v54 = vmax.f32 %v2047_v38, 0.0  ;;  %v2115_v30 = vpop.permute.xlu1 %2114 }
 0x6ac   : > { %v2080_v53 = vmax.f32 %v2058_v47, 0.0 }
 0x6ad   : > { %v2078_v55 = vmax.f32 %v2050_v50, 0.0 }
 0x6ae   : > { %v2086_v56 = vpack.c.bf16 %v2080_v53, %v2079_v52 }
 0x6af   : > { %v2085_v34 = vpack.c.bf16 %v2078_v55, %v2077_v54  ;;  %v2806_v58 = vpop.f32.mrb[44].mxu0 }
 0x6b0   : > { %v2071_v60 = vadd.f32 %v2806_v58, %v1973_v57  ;;  %v2062_v61 = vpop.f32.mrb[45].mxu0 }
 0x6b1   : > { %v2063_v63 = vadd.f32 %v2062_v61, %v1963_v45  ;;  %v2807_v0 = vpop.f32.mrb[46].mxu0  ;;  %2808 = vmatprep.subr.bf16.mxu1 %v2085_v34 }
 0x6b2   : > { %v2074_v1 = vadd.f32 %v2807_v0, %v1978_v62  ;;  %v2065_v2 = vpop.f32.mrb[47].mxu0  ;;  %2809 = vmatpush3.bf16.msra.mxu1 %v2085_v34  ;;  %v2083_v5 = vmax.f32 %v2071_v60, 0.0 }
 0x6b3   : > { %v2066_v3 = vadd.f32 %v2065_v2, %v1968_v49  ;;  %2810 = vmatprep.subr.bf16.mxu1 %v2086_v56  ;;  %v2081_v8 = vmax.f32 %v2063_v63, 0.0 }
 0x6b4   : > { %v2084_v6 = vmax.f32 %v2074_v1, 0.0 }
 0x6b5   : > { %v2082_v9 = vmax.f32 %v2066_v3, 0.0 }
 0x6b6   : > { %v2088_v10 = vpack.c.bf16 %v2084_v6, %v2083_v5  ;;  %2811 = vmatpush3.bf16.msra.mxu1 %v2086_v56 }
 0x6b7   : > { %v2087_v11 = vpack.c.bf16 %v2082_v9, %v2081_v8  ;;  %v2303_v12 = vpop.f32.mrb[48].mxu0 }
 0x6b8   : > { %v2307_v14 = vmul.f32 2.0, %v2303_v12  ;;  %v2826_v15 = vpop.f32.mrb[49].mxu0 }
 0x6b9   : > { %2812 = vmatprep.subr.bf16.mxu1 %v2087_v11 }
 0x6ba   : > { %v2308_v16 = vsub.f32 %v2233_v13, %v2307_v14  ;;  %2813 = vmatpush3.bf16.msra.mxu1 %v2087_v11 }
 0x6bb   : > { %2814 = vmatprep.subr.bf16.mxu1 %v2088_v10 }
 0x6bc   : > { %v2309_v17 = vmax.f32 %v2308_v16, 0.0 }
 0x6be   : > { %v2310_v19 = vadd.f32 1e-05, %v2309_v17  ;;  %2815 = vmatpush3.bf16.msra.mxu1 %v2088_v10 }
 0x6c0   : > { %v2311_v20 = vrot.slane %v2310_v19, 4 }
 0x6c1   : > { %2817 = vmatmul.mubr.msk.bf16.vlgmr.msra.gmra.mrb[20].mxu1 %vm1020_vm1, %v2912_v18 }
 0x6c2   : > { %v2312_v21 = vadd.f32 %v2311_v20, %v2310_v19 }
 0x6c4   : > { %v2313_v22 = vrot.slane %v2312_v21, 2 }
 0x6c6   : > { %v2314_v23 = vadd.f32 %v2313_v22, %v2312_v21 }
 0x6c8   : > { %v2315_v24 = vrot.slane %v2314_v23, 1 }
 0x6ca   : > { %v2316_v25 = vadd.f32 %v2315_v24, %v2314_v23 }
 0x6cc   : > { %2915 = vrcp.f32 %v2316_v25 }
 0x6d6   : > { %v2916_v26 = vpop.eup %2915 }
 0x6d7   : > { %v2318_v27 = vmul.f32 %v2916_v26, %v2310_v19 }
 0x6d9   : > { %2319 = vst [vmem:[%s760_s4] sm:$0xff] %v2318_v27 }
 0x794   : > { %v2818_v35 = vpop.f32.mrb[20].mxu1  ;;  %2334 = sbr.rel (!%p3101_p6) target bundleno = 1955 (0x7a3), region = 141 }
 0x795   : > { %v2176_v36 = vadd.f32 %v2818_v35, %v2110_v32  ;;  %v2167_v29 = vpop.f32.mrb[21].mxu1 }
 0x796   : > { %v2168_v33 = vadd.f32 %v2167_v29, %v2100_v28  ;;  %v2819_v39 = vpop.f32.mrb[22].mxu1 }
 0x797   : > { %2184 = vst [vmem:[%s731_s22 + $0x10] sm:$0xff] %v2176_v36  ;;  %v2179_v40 = vadd.f32 %v2819_v39, %v2115_v30  ;;  %v2170_v41 = vpop.f32.mrb[23].mxu1 }
 0x798   : > { %2182 = vst [vmem:[%s731_s22] sm:$0xff] %v2168_v33  ;;  %v2171_v42 = vadd.f32 %v2170_v41, %v2105_v31 }
 0x799   : > { %2185 = vst [vmem:[%s731_s22 + $0x18] sm:$0xff] %v2179_v40 }
 0x79a   : > { %2183 = vst [vmem:[%s731_s22 + $0x8] sm:$0xff] %v2171_v42 }
 0x79e   : > { %v2376_v44 = vld [vmem:[%s731_s22 + $0x10] sm:$0xff] }
 0x79f   : > { %v2372_v43 = vld [vmem:[%s731_s22] sm:$0xff]  ;;  %2377 = vst [vmem:[%s2338_s3 + $0x20] sm:$0xff] %v2376_v44 }
 0x7a0   : > { %v2378_v45 = vld [vmem:[%s731_s22 + $0x18] sm:$0xff]  ;;  %2373 = vst [vmem:[%s2338_s3] sm:$0xff] %v2372_v43 }
 0x7a1   : > { %v2374_v37 = vld [vmem:[%s731_s22 + $0x8] sm:$0xff]  ;;  %2379 = vst [vmem:[%s2338_s3 + $0x30] sm:$0xff] %v2378_v45 }
 0x7a2   : > { %2375 = vst [vmem:[%s2338_s3 + $0x10] sm:$0xff] %v2374_v37 }
 0x7a3 PF: > { %s31_s2 = sadd.s32 1, %s2955_s2   ;;  %s3583_s1 = sld [smem:[#allocation4_spill]] }
 0x7a4   : > { %p28_p12 = scmp.ge.s32.totalorder %s31_s2, 4   ;;  %s3584_s22 = sld [smem:[#allocation7_spill]] }
 0x7a5   : > { %s3585_s23 = sld [smem:[#allocation5_spill]]  ;;  %s3586_s24 = sld [smem:[#allocation6_spill]] }
 0x7a6   :  { %30 = sbr.rel (!%p28_p12) target bundleno = 10 (0xa), region = 228 }

</bundles_post_ra>
